<compile_context>
chip_gen: v6e
topology: v6e:2x2x1
jax: 0.10.0
libtpu: 0.0.40
codegen_flags: <defaults>
</compile_context>

<pallas_src>
import functools

import jax
import jax.numpy as jnp
import numpy as np
from jax.experimental import pallas as pl
from jax.experimental.pallas import tpu as pltpu


def _conf_conv_kernel(xp_ref, w_ref, b_ref, o_ref, *, H, W):
    """One batch element of a 3x3 / pad-1 conv.

    xp_ref: (1, H+2, W+2, Cin) bf16   padded NHWC input slab
    w_ref : (9, Cin, Cout)     bf16   3x3 taps, k = 3*dy + dx
    b_ref : (1, Cout)          f32
    o_ref : (1, H, W, Cout)    f32
    """
    Cin = xp_ref.shape[-1]
    Cout = o_ref.shape[-1]

    xp = xp_ref[...]            # (1, Hp, Wp, Cin) in VMEM
    w = w_ref[...]              # (9, Cin, Cout)

    acc = jnp.zeros((H * W, Cout), jnp.float32)
    for dy in range(3):         # static unroll over the 3x3 taps
        for dx in range(3):
            patch = xp[0, dy:dy + H, dx:dx + W, :].reshape(H * W, Cin)
            acc = acc + jnp.dot(patch, w[3 * dy + dx],
                                preferred_element_type=jnp.float32)
    acc = acc + b_ref[...]                       # f32 bias add
    o_ref[...] = acc.reshape(1, H, W, Cout)


def conv3x3_pallas(x_nhwc, w_hwio, b):
    """3x3 conv, stride 1, padding 1.  x_nhwc: (B,H,W,Cin), w_hwio: (3,3,Cin,Cout),
    b: (Cout,).  Returns flattened-per-batch output (B, H*W*Cout) in NHWC order."""
    B, H, W, Cin = x_nhwc.shape
    Cout = w_hwio.shape[-1]
    Hp, Wp = H + 2, W + 2

    # glue: bf16 cast + single zero-pad (no 9x im2col copies in HBM)
    xp = jnp.pad(x_nhwc.astype(jnp.bfloat16), ((0, 0), (1, 1), (1, 1), (0, 0)))
    w_flat = w_hwio.reshape(9, Cin, Cout).astype(jnp.bfloat16)
    b2d = b.reshape(1, Cout).astype(jnp.float32)

    kernel = functools.partial(_conf_conv_kernel, H=H, W=W)

    cost = pl.CostEstimate(
        flops=2 * 9 * B * H * W * Cin * Cout,
        transcendentals=0,
        bytes_accessed=(xp.size * 2 + w_flat.size * 2 + b2d.size * 4
                        + B * H * W * Cout * 4),
    )

    out = pl.pallas_call(
        kernel,
        out_shape=jax.ShapeDtypeStruct((B, H, W, Cout), jnp.float32),
        grid=(B,),
        in_specs=[
            pl.BlockSpec((1, Hp, Wp, Cin), lambda bb: (bb, 0, 0, 0)),
            pl.BlockSpec((9, Cin, Cout), lambda bb: (0, 0, 0)),
            pl.BlockSpec((1, Cout), lambda bb: (0, 0)),
        ],
        out_specs=pl.BlockSpec((1, H, W, Cout), lambda bb: (bb, 0, 0, 0)),
        compiler_params=pltpu.CompilerParams(
            dimension_semantics=("parallel",),       # megacore shard on v7x
            vmem_limit_bytes=32 * 1024 * 1024,       # safe on v5e/v6e/v7x
        ),
        cost_estimate=cost,
    )(xp, w_flat, b2d)

    return out.reshape(B, H * W * Cout)


def conv3x3_ref(x_nhwc, w_hwio, b):
    y = jax.lax.conv_general_dilated(
        x_nhwc, w_hwio, window_strides=(1, 1), padding=((1, 1), (1, 1)),
        dimension_numbers=("NHWC", "HWIO", "NHWC"))
    y = y + b[None, None, None, :]
    B = x_nhwc.shape[0]
    return y.reshape(B, -1)


class Confidence:
    """JAX/Pallas port of the PyTorch Confidence module."""

    # (in_channels, boxes_per_location) per source feature map
    _CFG = [(512, 4), (1024, 6), (512, 6), (256, 6), (256, 4), (256, 4)]

    def __init__(self, num_classes, key):
        self.num_classes = num_classes
        self.weights = []
        self.biases = []
        for i, (cin, nbox) in enumerate(self._CFG):
            cout = nbox * num_classes
            kw, kb = jax.random.split(jax.random.fold_in(key, i))
            # deterministic small init (synthetic; not a checkpoint load)
            w = jax.random.normal(kw, (3, 3, cin, cout), jnp.float32) * 0.02
            bb = jax.random.normal(kb, (cout,), jnp.float32) * 0.02
            self.weights.append(w)
            self.biases.append(bb)

    # TODO(synk): the six feature maps still run as six pallas_calls; fusing them
    # into one launch needs a ragged (per-map Cin/Cout) PrefetchScalarGridSpec.
    def __call__(self, *xs_nchw):
        assert len(xs_nchw) == 6
        B = xs_nchw[0].shape[0]
        ys = []
        for x, w, b in zip(xs_nchw, self.weights, self.biases):
            x_nhwc = jnp.transpose(x, (0, 2, 3, 1))  # NCHW -> NHWC (layout glue)
            ys.append(conv3x3_pallas(x_nhwc, w, b))
        y = jnp.concatenate(ys, axis=1)
        return y.reshape(B, -1, self.num_classes)

    def reference(self, *xs_nchw):
        B = xs_nchw[0].shape[0]
        ys = []
        for x, w, b in zip(xs_nchw, self.weights, self.biases):
            x_nhwc = jnp.transpose(x, (0, 2, 3, 1))
            ys.append(conv3x3_ref(x_nhwc, w, b))
        y = jnp.concatenate(ys, axis=1)
        return y.reshape(B, -1, self.num_classes)


if __name__ == "__main__":
    key = jax.random.PRNGKey(0)
    num_classes = 4
    B = 2
    # SSD-style pyramid, shrunk spatially (channels are fixed by the module).
    shapes = [
        (B, 512, 8, 8),
        (B, 1024, 4, 4),
        (B, 512, 4, 4),
        (B, 256, 2, 2),
        (B, 256, 2, 2),
        (B, 256, 1, 1),
    ]
    keys = jax.random.split(key, len(shapes) + 1)
    xs = [jax.random.normal(k, s, jnp.float32) for k, s in zip(keys[:-1], shapes)]

    model = Confidence(num_classes, keys[-1])

    out = model(*xs)
    out = jax.block_until_ready(out)

    ref = jax.block_until_ready(model.reference(*xs))
    assert out.shape == ref.shape, (out.shape, ref.shape)
    # bf16 operands with f32 accumulation vs. full-f32 reference -> bf16 tolerance.
    np.testing.assert_allclose(np.asarray(out), np.asarray(ref), rtol=2e-2, atol=2e-2)

    print("KERNEL_OK")
</pallas_src>

<mosaic_0001>
module attributes {stable_mosaic.version = 11 : i64} {
  func.func @_conf_conv_kernel(%arg0: i32, %arg1: memref<1x10x10x512xbf16, #tpu.memory_space<vmem>>, %arg2: memref<9x512x16xbf16, #tpu.memory_space<vmem>>, %arg3: memref<1x16xf32, #tpu.memory_space<vmem>>, %arg4: memref<1x8x8x16xf32, #tpu.memory_space<vmem>>) attributes {dimension_semantics = [#tpu.dimension_semantics<parallel>], iteration_bounds = array<i64: 2>, scalar_prefetch = 0 : i64, scratch_operands = 0 : i64, tpu.core_type = #tpu.core_type<tc>, window_params = [{transform_indices = @transform_0, window_bounds = array<i64: 1, 10, 10, 512>}, {pipeline_mode = #tpu.pipeline_mode<synchronous>, transform_indices = @transform_1, window_bounds = array<i64: 9, 512, 16>}, {pipeline_mode = #tpu.pipeline_mode<synchronous>, transform_indices = @transform_2, window_bounds = array<i64: 1, 16>}, {transform_indices = @transform_3, window_bounds = array<i64: 1, 8, 8, 16>}]} {
    %c0 = arith.constant 0 : index
    %c0_0 = arith.constant 0 : index
    %c0_1 = arith.constant 0 : index
    %c0_2 = arith.constant 0 : index
    %0 = vector.load %arg1[%c0, %c0_0, %c0_1, %c0_2] : memref<1x10x10x512xbf16, #tpu.memory_space<vmem>>, vector<1x10x10x512xbf16>
    %c0_3 = arith.constant 0 : index
    %c0_4 = arith.constant 0 : index
    %c0_5 = arith.constant 0 : index
    %1 = vector.load %arg2[%c0_3, %c0_4, %c0_5] : memref<9x512x16xbf16, #tpu.memory_space<vmem>>, vector<9x512x16xbf16>
    %cst = arith.constant 0.000000e+00 : f32
    %2 = vector.broadcast %cst : f32 to vector<64x16xf32>
    %3 = vector.extract_strided_slice %0 {offsets = [0, 0, 0, 0], sizes = [1, 8, 8, 512], strides = [1, 1, 1, 1]} : vector<1x10x10x512xbf16> to vector<1x8x8x512xbf16>
    %4 = vector.shape_cast %3 : vector<1x8x8x512xbf16> to vector<8x8x512xbf16>
    %5 = vector.shape_cast %4 : vector<8x8x512xbf16> to vector<64x512xbf16>
    %6 = vector.extract_strided_slice %1 {offsets = [0, 0, 0], sizes = [1, 512, 16], strides = [1, 1, 1]} : vector<9x512x16xbf16> to vector<1x512x16xbf16>
    %7 = vector.shape_cast %6 : vector<1x512x16xbf16> to vector<512x16xbf16>
    %cst_6 = arith.constant dense<0.000000e+00> : vector<64x16xf32>
    %8 = tpu.matmul %5, %7, %cst_6 {dimension_numbers = #tpu.dot_dimension_numbers<[1], [0], [0], [1], [0, 0, 1, 1], [], []>} : vector<64x512xbf16>, vector<512x16xbf16>, vector<64x16xf32> -> vector<64x16xf32>
    %9 = arith.addf %2, %8 : vector<64x16xf32>
    %10 = vector.extract_strided_slice %0 {offsets = [0, 0, 1, 0], sizes = [1, 8, 8, 512], strides = [1, 1, 1, 1]} : vector<1x10x10x512xbf16> to vector<1x8x8x512xbf16>
    %11 = vector.shape_cast %10 : vector<1x8x8x512xbf16> to vector<8x8x512xbf16>
    %12 = vector.shape_cast %11 : vector<8x8x512xbf16> to vector<64x512xbf16>
    %13 = vector.extract_strided_slice %1 {offsets = [1, 0, 0], sizes = [1, 512, 16], strides = [1, 1, 1]} : vector<9x512x16xbf16> to vector<1x512x16xbf16>
    %14 = vector.shape_cast %13 : vector<1x512x16xbf16> to vector<512x16xbf16>
    %cst_7 = arith.constant dense<0.000000e+00> : vector<64x16xf32>
    %15 = tpu.matmul %12, %14, %cst_7 {dimension_numbers = #tpu.dot_dimension_numbers<[1], [0], [0], [1], [0, 0, 1, 1], [], []>} : vector<64x512xbf16>, vector<512x16xbf16>, vector<64x16xf32> -> vector<64x16xf32>
    %16 = arith.addf %9, %15 : vector<64x16xf32>
    %17 = vector.extract_strided_slice %0 {offsets = [0, 0, 2, 0], sizes = [1, 8, 8, 512], strides = [1, 1, 1, 1]} : vector<1x10x10x512xbf16> to vector<1x8x8x512xbf16>
    %18 = vector.shape_cast %17 : vector<1x8x8x512xbf16> to vector<8x8x512xbf16>
    %19 = vector.shape_cast %18 : vector<8x8x512xbf16> to vector<64x512xbf16>
    %20 = vector.extract_strided_slice %1 {offsets = [2, 0, 0], sizes = [1, 512, 16], strides = [1, 1, 1]} : vector<9x512x16xbf16> to vector<1x512x16xbf16>
    %21 = vector.shape_cast %20 : vector<1x512x16xbf16> to vector<512x16xbf16>
    %cst_8 = arith.constant dense<0.000000e+00> : vector<64x16xf32>
    %22 = tpu.matmul %19, %21, %cst_8 {dimension_numbers = #tpu.dot_dimension_numbers<[1], [0], [0], [1], [0, 0, 1, 1], [], []>} : vector<64x512xbf16>, vector<512x16xbf16>, vector<64x16xf32> -> vector<64x16xf32>
    %23 = arith.addf %16, %22 : vector<64x16xf32>
    %24 = vector.extract_strided_slice %0 {offsets = [0, 1, 0, 0], sizes = [1, 8, 8, 512], strides = [1, 1, 1, 1]} : vector<1x10x10x512xbf16> to vector<1x8x8x512xbf16>
    %25 = vector.shape_cast %24 : vector<1x8x8x512xbf16> to vector<8x8x512xbf16>
    %26 = vector.shape_cast %25 : vector<8x8x512xbf16> to vector<64x512xbf16>
    %27 = vector.extract_strided_slice %1 {offsets = [3, 0, 0], sizes = [1, 512, 16], strides = [1, 1, 1]} : vector<9x512x16xbf16> to vector<1x512x16xbf16>
    %28 = vector.shape_cast %27 : vector<1x512x16xbf16> to vector<512x16xbf16>
    %cst_9 = arith.constant dense<0.000000e+00> : vector<64x16xf32>
    %29 = tpu.matmul %26, %28, %cst_9 {dimension_numbers = #tpu.dot_dimension_numbers<[1], [0], [0], [1], [0, 0, 1, 1], [], []>} : vector<64x512xbf16>, vector<512x16xbf16>, vector<64x16xf32> -> vector<64x16xf32>
    %30 = arith.addf %23, %29 : vector<64x16xf32>
    %31 = vector.extract_strided_slice %0 {offsets = [0, 1, 1, 0], sizes = [1, 8, 8, 512], strides = [1, 1, 1, 1]} : vector<1x10x10x512xbf16> to vector<1x8x8x512xbf16>
    %32 = vector.shape_cast %31 : vector<1x8x8x512xbf16> to vector<8x8x512xbf16>
    %33 = vector.shape_cast %32 : vector<8x8x512xbf16> to vector<64x512xbf16>
    %34 = vector.extract_strided_slice %1 {offsets = [4, 0, 0], sizes = [1, 512, 16], strides = [1, 1, 1]} : vector<9x512x16xbf16> to vector<1x512x16xbf16>
    %35 = vector.shape_cast %34 : vector<1x512x16xbf16> to vector<512x16xbf16>
    %cst_10 = arith.constant dense<0.000000e+00> : vector<64x16xf32>
    %36 = tpu.matmul %33, %35, %cst_10 {dimension_numbers = #tpu.dot_dimension_numbers<[1], [0], [0], [1], [0, 0, 1, 1], [], []>} : vector<64x512xbf16>, vector<512x16xbf16>, vector<64x16xf32> -> vector<64x16xf32>
    %37 = arith.addf %30, %36 : vector<64x16xf32>
    %38 = vector.extract_strided_slice %0 {offsets = [0, 1, 2, 0], sizes = [1, 8, 8, 512], strides = [1, 1, 1, 1]} : vector<1x10x10x512xbf16> to vector<1x8x8x512xbf16>
    %39 = vector.shape_cast %38 : vector<1x8x8x512xbf16> to vector<8x8x512xbf16>
    %40 = vector.shape_cast %39 : vector<8x8x512xbf16> to vector<64x512xbf16>
    %41 = vector.extract_strided_slice %1 {offsets = [5, 0, 0], sizes = [1, 512, 16], strides = [1, 1, 1]} : vector<9x512x16xbf16> to vector<1x512x16xbf16>
    %42 = vector.shape_cast %41 : vector<1x512x16xbf16> to vector<512x16xbf16>
    %cst_11 = arith.constant dense<0.000000e+00> : vector<64x16xf32>
    %43 = tpu.matmul %40, %42, %cst_11 {dimension_numbers = #tpu.dot_dimension_numbers<[1], [0], [0], [1], [0, 0, 1, 1], [], []>} : vector<64x512xbf16>, vector<512x16xbf16>, vector<64x16xf32> -> vector<64x16xf32>
    %44 = arith.addf %37, %43 : vector<64x16xf32>
    %45 = vector.extract_strided_slice %0 {offsets = [0, 2, 0, 0], sizes = [1, 8, 8, 512], strides = [1, 1, 1, 1]} : vector<1x10x10x512xbf16> to vector<1x8x8x512xbf16>
    %46 = vector.shape_cast %45 : vector<1x8x8x512xbf16> to vector<8x8x512xbf16>
    %47 = vector.shape_cast %46 : vector<8x8x512xbf16> to vector<64x512xbf16>
    %48 = vector.extract_strided_slice %1 {offsets = [6, 0, 0], sizes = [1, 512, 16], strides = [1, 1, 1]} : vector<9x512x16xbf16> to vector<1x512x16xbf16>
    %49 = vector.shape_cast %48 : vector<1x512x16xbf16> to vector<512x16xbf16>
    %cst_12 = arith.constant dense<0.000000e+00> : vector<64x16xf32>
    %50 = tpu.matmul %47, %49, %cst_12 {dimension_numbers = #tpu.dot_dimension_numbers<[1], [0], [0], [1], [0, 0, 1, 1], [], []>} : vector<64x512xbf16>, vector<512x16xbf16>, vector<64x16xf32> -> vector<64x16xf32>
    %51 = arith.addf %44, %50 : vector<64x16xf32>
    %52 = vector.extract_strided_slice %0 {offsets = [0, 2, 1, 0], sizes = [1, 8, 8, 512], strides = [1, 1, 1, 1]} : vector<1x10x10x512xbf16> to vector<1x8x8x512xbf16>
    %53 = vector.shape_cast %52 : vector<1x8x8x512xbf16> to vector<8x8x512xbf16>
    %54 = vector.shape_cast %53 : vector<8x8x512xbf16> to vector<64x512xbf16>
    %55 = vector.extract_strided_slice %1 {offsets = [7, 0, 0], sizes = [1, 512, 16], strides = [1, 1, 1]} : vector<9x512x16xbf16> to vector<1x512x16xbf16>
    %56 = vector.shape_cast %55 : vector<1x512x16xbf16> to vector<512x16xbf16>
    %cst_13 = arith.constant dense<0.000000e+00> : vector<64x16xf32>
    %57 = tpu.matmul %54, %56, %cst_13 {dimension_numbers = #tpu.dot_dimension_numbers<[1], [0], [0], [1], [0, 0, 1, 1], [], []>} : vector<64x512xbf16>, vector<512x16xbf16>, vector<64x16xf32> -> vector<64x16xf32>
    %58 = arith.addf %51, %57 : vector<64x16xf32>
    %59 = vector.extract_strided_slice %0 {offsets = [0, 2, 2, 0], sizes = [1, 8, 8, 512], strides = [1, 1, 1, 1]} : vector<1x10x10x512xbf16> to vector<1x8x8x512xbf16>
    %60 = vector.shape_cast %59 : vector<1x8x8x512xbf16> to vector<8x8x512xbf16>
    %61 = vector.shape_cast %60 : vector<8x8x512xbf16> to vector<64x512xbf16>
    %62 = vector.extract_strided_slice %1 {offsets = [8, 0, 0], sizes = [1, 512, 16], strides = [1, 1, 1]} : vector<9x512x16xbf16> to vector<1x512x16xbf16>
    %63 = vector.shape_cast %62 : vector<1x512x16xbf16> to vector<512x16xbf16>
    %cst_14 = arith.constant dense<0.000000e+00> : vector<64x16xf32>
    %64 = tpu.matmul %61, %63, %cst_14 {dimension_numbers = #tpu.dot_dimension_numbers<[1], [0], [0], [1], [0, 0, 1, 1], [], []>} : vector<64x512xbf16>, vector<512x16xbf16>, vector<64x16xf32> -> vector<64x16xf32>
    %65 = arith.addf %58, %64 : vector<64x16xf32>
    %c0_15 = arith.constant 0 : index
    %c0_16 = arith.constant 0 : index
    %66 = vector.load %arg3[%c0_15, %c0_16] : memref<1x16xf32, #tpu.memory_space<vmem>>, vector<1x16xf32>
    %67 = vector.broadcast %66 : vector<1x16xf32> to vector<64x16xf32>
    %68 = arith.addf %65, %67 : vector<64x16xf32>
    %69 = vector.shape_cast %68 : vector<64x16xf32> to vector<1x8x8x16xf32>
    %c0_17 = arith.constant 0 : index
    %c0_18 = arith.constant 0 : index
    %c0_19 = arith.constant 0 : index
    %c0_20 = arith.constant 0 : index
    %70 = vector.load %arg4[%c0_17, %c0_18, %c0_19, %c0_20] : memref<1x8x8x16xf32, #tpu.memory_space<vmem>>, vector<1x8x8x16xf32>
    tpu.vector_store %arg4[%c0_17, %c0_18, %c0_19, %c0_20], %69 {strides = array<i32>} : memref<1x8x8x16xf32, #tpu.memory_space<vmem>>, vector<1x8x8x16xf32>,
    return
  }
  func.func @transform_0(%arg0: i32) -> (i32, i32, i32, i32) {
    %c0_i32 = arith.constant 0 : i32
    %c0_i32_0 = arith.constant 0 : i32
    %c0_i32_1 = arith.constant 0 : i32
    %c0_i32_2 = arith.constant 0 : i32
    return %arg0, %c0_i32, %c0_i32_0, %c0_i32_1 : i32, i32, i32, i32
  }
  func.func @transform_1(%arg0: i32) -> (i32, i32, i32) {
    %c0_i32 = arith.constant 0 : i32
    %c0_i32_0 = arith.constant 0 : i32
    %c0_i32_1 = arith.constant 0 : i32
    %c0_i32_2 = arith.constant 0 : i32
    return %c0_i32, %c0_i32_0, %c0_i32_1 : i32, i32, i32
  }
  func.func @transform_2(%arg0: i32) -> (i32, i32) {
    %c0_i32 = arith.constant 0 : i32
    %c0_i32_0 = arith.constant 0 : i32
    %c0_i32_1 = arith.constant 0 : i32
    return %c0_i32, %c0_i32_0 : i32, i32
  }
  func.func @transform_3(%arg0: i32) -> (i32, i32, i32, i32) {
    %c0_i32 = arith.constant 0 : i32
    %c0_i32_0 = arith.constant 0 : i32
    %c0_i32_1 = arith.constant 0 : i32
    %c0_i32_2 = arith.constant 0 : i32
    return %arg0, %c0_i32, %c0_i32_0, %c0_i32_1 : i32, i32, i32, i32
  }
}

</mosaic_0001>

<bundles_post_ra>
// kernel: tpu_custom_call.1
= control target key start
LH: loop header
LB: loop body
LE: loop exit
PB: predicated region body
PF: predicated region fallthrough
CT: control target
= control target key end

     0   :  { %8 = vsyncpa [#allocation3], 0  ;;  %s8289_s0 = inlined_call_operand.vmem [shape: bf16[2,10,10,512], index: 0, kind: input, shape index: {}]   ;;  %s8290_s1 = inlined_call_operand.vmem [shape: bf16[9,512,16], index: 1, kind: input, shape index: {}]   ;;  %s8291_s2 = inlined_call_operand.vmem [shape: f32[1,16], index: 2, kind: input, shape index: {}]   ;;  %s8292_s3 = inlined_call_operand.hbm [shape: f32[2,8,8,16], index: 3, kind: output, shape index: {}]  }
   0x1   :  { %10 = vsyncpa [#allocation3 + $0x1], 0  ;;  %s6150_s12 = smov 0   ;;  %s6152_s13 = smov 0  }
   0x2   :  { %s6154_s14 = smov 0   ;;  %s6156_s15 = smov 0  }
   0x3 LB: > { %s6171_s16 = sadd.s32 4294967295, %s6125_s15   ;;  %s4582_s17 = sadd.s32 4294967294, %s6125_s15   ;;  %s6125_s15 = sphi %s6156_s15, %s8452_s15   ;;  %s6121_s14 = sphi %s6154_s14, %s8451_s14   ;;  %s6117_s13 = sphi %s6152_s13, %s8450_s13   ;;  %s6113_s12 = sphi %s6150_s12, %s8449_s12  }
   0x4   : > { %s6175_s18 = sadd.s32 1, %s6125_s15   ;;  %s91_s19 = sadd.s32 1, %s6121_s14 }
   0x5   : > { %s88_s20 = ssub.s32 %s6125_s15, %s6175_s18  ;;  %p101_p0 = scmp.ne.s32.totalorder %s6121_s14, %s6117_s13 }
   0x6   : > { %p89_p1 = scmp.eq.s32.totalorder %s88_s20, 0  ;;  %p102_p2 = scmp.eq.s32.totalorder %s6171_s16, 1 }
   0x7   : > { %p107_p3 = scmp.ne.s32.totalorder %s6117_s13, %s6113_s12  ;;  %p108_p4 = scmp.eq.s32.totalorder %s4582_s17, 1 }
   0x8   : > { %s6186_s21 = scalar_select %p89_p1, %s6121_s14, %s91_s19  }
   0x9   : > { %p6188_p5 = por %p102_p2, %p101_p0  ;;  %p6192_p6 = por %p108_p4, %p107_p3 }
   0xa   : > { %p4585_p7 = scmp.ge.s32.totalorder %s6125_s15, 1  ;;  %p140_p8 = scmp.lt.s32.totalorder %s6125_s15, 3 }
   0xc   : > { %p141_p9 = pnand %p4585_p7, %p140_p8 }
   0xe   : > { %144 = sbr.rel (%p141_p9) target bundleno = 568 (0x238), region = 32 }
  0x13   : > { %v5773_v0 = vld [vmem:[%s8290_s1 + $0x178] sm:$0xff]   ;;  %v5777_v4 = vld [vmem:[%s8290_s1 + $0x170] sm:$0xff]   ;;  %v5781_v8 = vld [vmem:[%s8290_s1 + $0x168] sm:$0xff]   ;;  %p164_p10 = scmp.lt.s32.totalorder %s6171_s16, 1  ;;  %vm786_vm0 = vsmask.f32 3328 }
  0x14   : > { %v5774_v1 = vld [vmem:[%s8290_s1 + $0x1f8] sm:$0xff]   ;;  %5011 = vmatprep.subr.bf16.mxu0 %v5773_v0  ;;  %v5778_v5 = vld [vmem:[%s8290_s1 + $0x1f0] sm:$0xff]   ;;  %v5782_v9 = vld [vmem:[%s8290_s1 + $0x1e8] sm:$0xff]   ;;  %vm787_vm1 = vsmask.f32 7440  ;;  %vm1817_vm3 = vcmask 1042432  }
  0x15   : > { %v5775_v2 = vld [vmem:[%s8290_s1 + $0x138] sm:$0xff]   ;;  %5051 = vmatprep.subr.bf16.mxu1 %v5774_v1  ;;  %v5779_v6 = vld [vmem:[%s8290_s1 + $0x130] sm:$0xff]   ;;  %v5783_v10 = vld [vmem:[%s8290_s1 + $0x128] sm:$0xff]   ;;  %s165_s5 = scalar_select %p164_p10, %s6171_s16, 1  ;;  %vm1818_vm4 = vcmask 1046532   ;;  %vm4497_vm6 = vcmask 130048  }
  0x16   : > { %v5776_v3 = vld [vmem:[%s8290_s1 + $0x1b8] sm:$0xff]   ;;  %5012 = vmatpush3.bf16.msra.mxu0 %v5775_v2  ;;  %v5780_v7 = vld [vmem:[%s8290_s1 + $0x1b0] sm:$0xff]   ;;  %v5784_v11 = vld [vmem:[%s8290_s1 + $0x1a8] sm:$0xff]   ;;  %s161_s19 = sand.u32 1, %s6117_s13   ;;  %s5010_s26 = sshll.u32 %s6171_s16, 10 }
  0x17   : > { %5052 = vmatpush3.bf16.msra.mxu1 %v5776_v3  ;;  %5013 = vmatprep.subr.bf16.mxu0 %v5777_v4  ;;  %v5785_v12 = vld [vmem:[%s8290_s1 + $0x160] sm:$0xff]   ;;  %v5789_v16 = vld [vmem:[%s8290_s1 + $0x158] sm:$0xff]   ;;  %v5793_v20 = vld [vmem:[%s8290_s1 + $0x150] sm:$0xff]   ;;  %s5731_s20 = smul.u32 320, %s165_s5  ;;  %s8240_s30 = scalar_lea.hbm %s8292_s3, %s5010_s26 }
  0x18   : > { %5053 = vmatprep.subr.bf16.mxu1 %v5778_v5  ;;  %v5786_v13 = vld [vmem:[%s8290_s1 + $0x1e0] sm:$0xff]   ;;  %v5790_v17 = vld [vmem:[%s8290_s1 + $0x1d8] sm:$0xff]   ;;  %v5794_v21 = vld [vmem:[%s8290_s1 + $0x1d0] sm:$0xff]   ;;  %s8249_s16 = scalar_lea.sflag [#allocation3], %s161_s19  ;;  %s6127_s5 = smov [#allocation2]  }
  0x19   : > { %v5787_v14 = vld [vmem:[%s8290_s1 + $0x120] sm:$0xff]   ;;  %v5791_v18 = vld [vmem:[%s8290_s1 + $0x118] sm:$0xff]   ;;  %v5795_v22 = vld [vmem:[%s8290_s1 + $0x110] sm:$0xff]   ;;  %s6293_s7 = scalar_lea.vmem %s8289_s0, %s5731_s20  ;;  %s4586_s20 = sshll.u32 %s161_s19, 6 }
  0x1a   : > { %5014 = vmatpush3.bf16.msra.mxu0 %v5779_v6  ;;  %v5788_v15 = vld [vmem:[%s8290_s1 + $0x1a0] sm:$0xff]   ;;  %v5792_v19 = vld [vmem:[%s8290_s1 + $0x198] sm:$0xff]   ;;  %v5796_v23 = vld [vmem:[%s8290_s1 + $0x190] sm:$0xff]   ;;  %s8180_s25 = scalar_lea.vmem [#allocation2], %s4586_s20  ;;  %s6069_s6 = sshll.u32 %s6127_s5, 4  ;;  %s6070_s6 = int_to_ptr.vmem [resolvable:$false] %s6069_s6 }
  0x1b   : > { %5054 = vmatpush3.bf16.msra.mxu1 %v5780_v7  ;;  %5015 = vmatprep.subr.bf16.mxu0 %v5781_v8  ;;  %v5797_v24 = vld [vmem:[%s8290_s1 + $0x148] sm:$0xff]   ;;  %v5801_v28 = vld [vmem:[%s8290_s1 + $0x140] sm:$0xff]   ;;  %v6305_v33 = vld [vmem:[%s6293_s7 + $0x10] sm:$0x11]  ;;  %s4520_s27 = sshll.u32 %s8180_s25, 4  ;;  %s6071_s8 = scalar_lea.vmem %s6070_s6, 2048  ;;  %s8242_s27 = int_to_ptr.vmem [resolvable:$true] %s4520_s27 }
  0x1c   : > { %5055 = vmatprep.subr.bf16.mxu1 %v5782_v9  ;;  %v5798_v25 = vld [vmem:[%s8290_s1 + $0x1c8] sm:$0xff]   ;;  %v5802_v29 = vld [vmem:[%s8290_s1 + $0x1c0] sm:$0xff]   ;;  %v6311_v35 = vld [vmem:[%s6293_s7 + $0x30] sm:$0x11]  ;;  %v799_v40 = vshll.u32 %v6305_v33, 16  ;;  %v1822_v59 = vrot.slane %v6305_v33, 5  ;;  %p6072_p0 = scmp.lt.s32.totalorder %s8242_s27, %s6070_s6 }
  0x1d   : > { %v5799_v26 = vld [vmem:[%s8290_s1 + $0x108] sm:$0xff]   ;;  %v5803_v30 = vld [vmem:[%s8290_s1 + $0x100] sm:$0xff]   ;;  %v6317_v37 = vld [vmem:[%s6293_s7 + $0x50] sm:$0x11]  ;;  %v827_v44 = vshll.u32 %v6311_v35, 16  ;;  %s6065_s4 = scalar_lea.vmem %s8242_s27, 1024 }
  0x1e   : > { %5016 = vmatpush3.bf16.msra.mxu0 %v5783_v10  ;;  %v5800_v27 = vld [vmem:[%s8290_s1 + $0x188] sm:$0xff]   ;;  %v5804_v31 = vld [vmem:[%s8290_s1 + $0x180] sm:$0xff]   ;;  %v6331_v50 = vld [vmem:[%s6293_s7 + $0x18] sm:$0x11]  ;;  %v801_v51 = vrot.slane %v799_v40, 5  ;;  %v855_v54 = vshll.u32 %v6317_v37, 16  ;;  %p6066_p11 = scmp.ne.s32.totalorder %s8242_s27, %s6065_s4  ;;  %p6073_p1 = scmp.lt.s32.totalorder %s6071_s8, %s6065_s4 }
  0x1f   : > { %5056 = vmatpush3.bf16.msra.mxu1 %v5784_v11  ;;  %5017 = vmatprep.subr.bf16.mxu0 %v5785_v12  ;;  %v6302_v32 = vld [vmem:[%s6293_s7] sm:$0xff]  ;;  %v6328_v49 = vld [vmem:[%s6293_s7 + $0x8] sm:$0xff]  ;;  %v829_v57 = vrot.slane %v827_v44, 5  ;;  %v6339_v60 = vld [vmem:[%s6293_s7 + $0x38] sm:$0x11]  ;;  %v813_v7 = vshll.u32 %v6331_v50, 16 }
  0x20   : > { %5057 = vmatprep.subr.bf16.mxu1 %v5786_v13  ;;  %v6308_v34 = vld [vmem:[%s6293_s7 + $0x20] sm:$0xff]  ;;  %v790_v38 = vshrl.u32 %v6302_v32, 16  ;;  %v793_v39 = vshll.u32 %v6302_v32, 16  ;;  %v6335_v55 = vld [vmem:[%s6293_s7 + $0x28] sm:$0xff]  ;;  %v5805_v61 = vld [vmem:[%s8290_s1 + $0x78] sm:$0xff]   ;;  %v857_v0 = vrot.slane %v855_v54, 5  ;;  %p6067_p12 = pnand %p6066_p11, %p6188_p5  ;;  %p6074_p2 = por %p6073_p1, %p6072_p0 }
  0x21   : > { %v6314_v36 = vld [vmem:[%s6293_s7 + $0x40] sm:$0xff]  ;;  %v818_v41 = vshrl.u32 %v6308_v34, 16  ;;  %v821_v43 = vshll.u32 %v6308_v34, 16  ;;  %vm6346_vm2 = vmor %vm786_vm0, %vm787_vm1  ;;  %v804_v1 = vshrl.u32 %v6328_v49, 16  ;;  %v807_v2 = vshll.u32 %v6328_v49, 16  ;;  %v5806_v3 = vld [vmem:[%s8290_s1 + $0xf8] sm:$0xff]  }
  0x22   : > { %5018 = vmatpush3.bf16.msra.mxu0 %v5787_v14  ;;  %v792_v42 = vrot.slane %v790_v38, 4  ;;  %v846_v45 = vshrl.u32 %v6314_v36, 16  ;;  %v795_v46 = vrot.slane %v793_v39, 5  ;;  %v849_v48 = vshll.u32 %v6314_v36, 16  ;;  %v6356_v6 = vld [vmem:[%s6293_s7 + $0x48] sm:$0xff]  ;;  %vm6442_vm5 = vmor %vm1817_vm3, %vm1818_vm4  ;;  %p6068_p13 = pneg %p6067_p12 }
  0x23   : > { %5058 = vmatpush3.bf16.msra.mxu1 %v5788_v15  ;;  %5019 = vmatprep.subr.bf16.mxu0 %v5789_v16  ;;  %v820_v47 = vrot.slane %v818_v41, 4  ;;  %v823_v52 = vrot.slane %v821_v43, 5  ;;  %v832_v8 = vshrl.u32 %v6335_v55, 16  ;;  %v6361_v10 = vld [vmem:[%s6293_s7 + $0x58] sm:$0x11]  ;;  %v806_v11 = vrot.slane %v804_v1, 4 }
  0x24   : > { %5059 = vmatprep.subr.bf16.mxu1 %v5790_v17  ;;  %v848_v53 = vrot.slane %v846_v45, 4  ;;  %v796_v56 = vor.u32 %v795_v46, %v792_v42  ;;  %v851_v58 = vrot.slane %v849_v48, 5  ;;  %v809_v12 = vrot.slane %v807_v2, 5  ;;  %v5811_v46 = vld [vmem:[%s8290_s1 + $0x30] sm:$0xff]   ;;  %v5808_v48 = vld [vmem:[%s8290_s1 + $0xb8] sm:$0xff]   ;;  %v6422_v2 = vld [vmem:[%s6293_s7 + $0x68] sm:$0xff]  ;;  %p6075_p3 = pnand %p6074_p2, %p6068_p13 }
  0x25   : > { %v824_v63 = vor.u32 %v823_v52, %v820_v47  ;;  %v835_v13 = vshll.u32 %v6335_v55, 16  ;;  %v815_v16 = vrot.slane %v813_v7, 5  ;;  %v834_v17 = vrot.slane %v832_v8, 4  ;;  %v6419_v1 = vld [vmem:[%s6293_s7 + $0x70] sm:$0x11]  ;;  %v6056_v62 = vld [vmem:[%s8290_s1 + $0x888] sm:$0xff]  }
  0x26   : > { %5020 = vmatpush3.bf16.msra.mxu0 %v5791_v18  ;;  %v797_v4 = vrot.slane %v796_v56, 4  ;;  %v852_v5 = vor.u32 %v851_v58, %v848_v53  ;;  %v5807_v18 = vld [vmem:[%s8290_s1 + $0x38] sm:$0xff]   ;;  %v1830_v38 = vrot.slane %v6311_v35, 5  ;;  %v863_v40 = vshll.u32 %v6356_v6, 16  ;;  %v5810_v53 = vld [vmem:[%s8290_s1 + $0xf0] sm:$0xff]  }
  0x27   : > { %5060 = vmatpush3.bf16.msra.mxu1 %v5792_v19  ;;  %5021 = vmatprep.subr.bf16.mxu0 %v5793_v20  ;;  %v825_v9 = vrot.slane %v824_v63, 4  ;;  %v810_v20 = vor.u32 %v809_v12, %v806_v11  ;;  %v869_v41 = vshll.u32 %v6361_v10, 16  ;;  %v1826_v44 = vrot.slane %v6331_v50, 5  ;;  %v6429_v8 = vld [vmem:[%s6293_s7 + $0x78] sm:$0x11] }
  0x28   : > { %5061 = vmatprep.subr.bf16.mxu1 %v5794_v21  ;;  %v802_v14 = vsel %vm6346_vm2, %v797_v4, %v801_v51  ;;  %v853_v15 = vrot.slane %v852_v5, 4  ;;  %v837_v21 = vrot.slane %v835_v13, 5  ;;  %v1834_v45 = vrot.slane %v6339_v60, 5  ;;  %v6677_v51 = vld [vmem:[%s6293_s7 + $0xd8] sm:$0x11] }
  0x29   : > { %v6371_v19 = vsel %vm6346_vm2, %v825_v9, %v829_v57  ;;  %v865_v35 = vrot.slane %v863_v40, 5  ;;  %v871_v47 = vrot.slane %v869_v41, 5  ;;  %v4684_v54 = vrot.slane %v6302_v32, 9  ;;  %v6684_v33 = vld [vmem:[%s6293_s7 + $0xf8] sm:$0x11] }
  0x2a   : > { %5022 = vmatpush3.bf16.msra.mxu0 %v5795_v22  ;;  %v841_v22 = vshll.u32 %v6339_v60, 16  ;;  %v883_v7 = vshll.u32 %v6419_v1, 16  ;;  %v888_v9 = vshrl.u32 %v6422_v2, 16  ;;  %v891_v12 = vshll.u32 %v6422_v2, 16 }
  0x2b   : > { %5062 = vmatpush3.bf16.msra.mxu1 %v5796_v23  ;;  %5023 = vmatprep.subr.bf16.mxu0 %v5797_v24  ;;  %v6376_v23 = vsel %vm6346_vm2, %v853_v15, %v857_v0  ;;  %v4588_v24 = vcombine.low %v802_v14, %v6371_v19  ;;  %v6416_v0 = vld [vmem:[%s6293_s7 + $0x60] sm:$0xff]  ;;  %v897_v13 = vshll.u32 %v6429_v8, 16  ;;  %v5812_v15 = vld [vmem:[%s8290_s1 + $0xb0] sm:$0xff]   ;;  %v4685_v41 = vrot.slane %v6328_v49, 9 }
  0x2c   : > { %5063 = vmatprep.subr.bf16.mxu1 %v5798_v25  ;;  %8325 = vst [vmem:[#allocation5_spill] sm:$0xff] %v6376_v23  ;;  %v4589_v25 = vcombine.high %v802_v14, %v6371_v19  ;;  %v874_v4 = vshrl.u32 %v6416_v0, 16  ;;  %v877_v5 = vshll.u32 %v6416_v0, 16  ;;  %v5813_v14 = vld [vmem:[%s8290_s1 + $0x68] sm:$0xff]  }
  0x2e   : > { %5024 = vmatpush3.bf16.msra.mxu0 %v5799_v26  ;;  %v860_v26 = vshrl.u32 %v6356_v6, 16  ;;  %1301 = vmatprep.mubr.bf16.mxu0 %v4589_v25 }
  0x2f   : > { %5064 = vmatpush3.bf16.msra.mxu1 %v5800_v27  ;;  %5025 = vmatprep.subr.bf16.mxu0 %v5801_v28  ;;  %v5809_v27 = vld [vmem:[%s8290_s1 + $0x70] sm:$0xff]  }
  0x30   : > { %5065 = vmatprep.subr.bf16.mxu1 %v5802_v29  ;;  %v811_v29 = vrot.slane %v810_v20, 4  ;;  %v862_v39 = vrot.slane %v860_v26, 4 }
  0x32   : > { %5026 = vmatpush3.bf16.msra.mxu0 %v5803_v30  ;;  %v838_v30 = vor.u32 %v837_v21, %v834_v17  ;;  %v816_v42 = vsel %vm6346_vm2, %v811_v29, %v815_v16  ;;  %v866_v58 = vor.u32 %v865_v35, %v862_v39  ;;  %v876_v16 = vrot.slane %v874_v4, 4  ;;  %v5814_v29 = vld [vmem:[%s8290_s1 + $0xe8] sm:$0xff]  }
  0x33   : > { %5066 = vmatpush3.bf16.msra.mxu1 %v5804_v31  ;;  %5091 = vmatprep.subr.bf16.mxu0 %v5805_v61  ;;  %v843_v31 = vrot.slane %v841_v22, 5  ;;  %v879_v17 = vrot.slane %v877_v5, 5  ;;  %v885_v22 = vrot.slane %v883_v7, 5  ;;  %v6462_v39 = vsel %vm6442_vm5, %v4684_v54, %v1822_v59  ;;  %v5820_v5 = vld [vmem:[%s8290_s1 + $0xa0] sm:$0xff]  }
  0x34   : > { %5131 = vmatprep.subr.bf16.mxu1 %v5806_v3  ;;  %v839_v43 = vrot.slane %v838_v30, 4  ;;  %v4686_v3 = vrot.slane %v6308_v34, 9  ;;  %v867_v11 = vrot.slane %v866_v58, 4  ;;  %v4687_v54 = vrot.slane %v6335_v55, 9  ;;  %v6523_v7 = vld [vmem:[%s6293_s7 + $0x80] sm:$0xff] }
  0x35   : > { %1302 = vmatmul.mubr.bf16.vlgmr.msra.gmra.mxu0 %v4588_v24  ;;  %v893_v24 = vrot.slane %v891_v12, 5  ;;  %v880_v26 = vor.u32 %v879_v17, %v876_v16  ;;  %v1838_v12 = vrot.slane %v6317_v37, 5  ;;  %v905_v60 = vshll.u32 %v6523_v7, 16 }
  0x36   : > { %5092 = vmatpush3.bf16.msra.mxu0 %v5807_v18  ;;  %v6403_v52 = vsel %vm6346_vm2, %v839_v43, %v843_v31  ;;  %v890_v18 = vrot.slane %v888_v9, 4  ;;  %v6448_v21 = vsel %vm6346_vm2, %v867_v11, %v871_v47  ;;  %v5815_v31 = vld [vmem:[%s8290_s1 + $0x28] sm:$0xff]   ;;  %v6466_v40 = vsel %vm6442_vm5, %v4686_v3, %v1830_v38  ;;  %v5817_v38 = vld [vmem:[%s8290_s1 + $0x60] sm:$0xff]   ;;  %v6526_v9 = vld [vmem:[%s6293_s7 + $0x90] sm:$0x11] }
  0x37   : > { %8326 = vst [vmem:[#allocation6_spill] sm:$0xff] %v6403_v52  ;;  %5093 = vmatprep.subr.bf16.mxu0 %v5809_v27  ;;  %v4590_v61 = vcombine.low %v816_v42, %v6403_v52  ;;  %v4591_v63 = vcombine.high %v816_v42, %v6403_v52  ;;  %8329 = vst [vmem:[#allocation7_spill] sm:$0xff] %v6448_v21  ;;  %v899_v27 = vrot.slane %v897_v13, 5  ;;  %v881_v42 = vrot.slane %v880_v26, 4  ;;  %v5816_v43 = vld [vmem:[%s8290_s1 + $0xa8] sm:$0xff]   ;;  %v6537_v13 = vld [vmem:[%s6293_s7 + $0xa0] sm:$0xff] }
  0x38   : > { %v894_v30 = vor.u32 %v893_v24, %v890_v18  ;;  %v6485_v47 = vsel %vm6442_vm5, %v4685_v41, %v1826_v44  ;;  %v6532_v11 = vsel %vm6442_vm5, %v4687_v54, %v1834_v45  ;;  %v911_v16 = vshll.u32 %v6526_v9, 16  ;;  %v6556_v24 = vld [vmem:[%s6293_s7 + $0x98] sm:$0x11] }
  0x39   : > { %1366 = vmatprep.mubr.bf16.mxu1 %v4591_v63  ;;  %v4688_v63 = vrot.slane %v6314_v36, 9  ;;  %v930_v37 = vshrl.u32 %v6537_v13, 16  ;;  %v933_v17 = vshll.u32 %v6537_v13, 16  ;;  %v925_v25 = vshll.u32 %v6556_v24, 16 }
  0x3a   : > { %5094 = vmatpush3.bf16.msra.mxu0 %v5811_v46  ;;  %1367 = vmatmul.mubr.bf16.vlgmr.msra.gmra.mxu1 %v4590_v61  ;;  %v895_v35 = vrot.slane %v894_v30, 4  ;;  %v5819_v61 = vld [vmem:[%s8290_s1 + $0x20] sm:$0xff]   ;;  %v6560_v30 = vld [vmem:[%s6293_s7 + $0xa8] sm:$0xff] }
  0x3b   : > { %5132 = vmatpush3.bf16.msra.mxu1 %v5808_v48  ;;  %5095 = vmatprep.subr.bf16.mxu0 %v5813_v14  ;;  %v6489_v48 = vsel %vm6346_vm2, %v881_v42, %v885_v22  ;;  %v6540_v14 = vld [vmem:[%s6293_s7 + $0xb0] sm:$0x11]  ;;  %v6553_v22 = vld [vmem:[%s6293_s7 + $0x88] sm:$0xff]  ;;  %v932_v41 = vrot.slane %v930_v37, 4  ;;  %v935_v42 = vrot.slane %v933_v17, 5 }
  0x3c   : > { %5133 = vmatprep.subr.bf16.mxu1 %v5810_v53  ;;  %v5818_v53 = vld [vmem:[%s8290_s1 + $0xe0] sm:$0xff]   ;;  %v6497_v50 = vcombine.high %v6376_v23, %v6489_v48  ;;  %v6501_v44 = vsel %vm6346_vm2, %v895_v35, %v899_v27  ;;  %v6505_v58 = vcombine.low %v6376_v23, %v6489_v48  ;;  %v939_v18 = vshll.u32 %v6540_v14, 16 }
  0x3d   : > { %v6513_v3 = vcombine.high %v6448_v21, %v6501_v44  ;;  %v6517_v4 = vcombine.low %v6448_v21, %v6501_v44  ;;  %v907_v27 = vrot.slane %v905_v60, 5  ;;  %v916_v35 = vshrl.u32 %v6553_v22, 16 }
  0x3e   : > { %5096 = vmatpush3.bf16.msra.mxu0 %v5815_v31  ;;  %8330 = vst [vmem:[#allocation8_spill] sm:$0xff] %v6497_v50  ;;  %8331 = vst [vmem:[#allocation9_spill] sm:$0xff] %v6505_v58  ;;  %1309 = vmatprep.mubr.bf16.mxu0 %v6497_v50  ;;  %v6563_v31 = vld [vmem:[%s6293_s7 + $0xb8] sm:$0x11]  ;;  %v919_v54 = vshll.u32 %v6553_v22, 16  ;;  %v936_v60 = vor.u32 %v935_v42, %v932_v41 }
  0x3f   : > { %5134 = vmatpush3.bf16.msra.mxu1 %v5812_v15  ;;  %5097 = vmatprep.subr.bf16.mxu0 %v5817_v38  ;;  %8332 = vst [vmem:[#allocation10_spill] sm:$0xff] %v6513_v3  ;;  %8333 = vst [vmem:[#allocation11_spill] sm:$0xff] %v6517_v4  ;;  %v902_v15 = vshrl.u32 %v6523_v7, 16  ;;  %v953_v37 = vshll.u32 %v6563_v31, 16  ;;  %v5823_v41 = vld [vmem:[%s8290_s1 + $0x18] sm:$0xff]  }
  0x40   : > { %5135 = vmatprep.subr.bf16.mxu1 %v5814_v29  ;;  %1374 = vmatprep.mubr.bf16.mxu1 %v6513_v3  ;;  %v913_v29 = vrot.slane %v911_v16, 5  ;;  %v918_v16 = vrot.slane %v916_v35, 4  ;;  %v937_v28 = vrot.slane %v936_v60, 4 }
  0x41   : > { %1310 = vmatmul.mubr.bf16.gmra.mxu0 %v6505_v58  ;;  %v904_v26 = vrot.slane %v902_v15, 4  ;;  %v5821_v15 = vld [vmem:[%s8290_s1 + $0x58] sm:$0xff]   ;;  %v955_v57 = vrot.slane %v953_v37, 5 }
  0x42   : > { %1375 = vmatmul.mubr.bf16.gmra.mxu1 %v6517_v4  ;;  %5098 = vmatpush3.bf16.msra.mxu0 %v5819_v61  ;;  %v947_v61 = vshll.u32 %v6560_v30, 16 }
  0x43   : > { %5136 = vmatpush3.bf16.msra.mxu1 %v5816_v43  ;;  %v941_v43 = vrot.slane %v939_v18, 5  ;;  %v908_v38 = vor.u32 %v907_v27, %v904_v26  ;;  %v921_v18 = vrot.slane %v919_v54, 5  ;;  %v927_v26 = vrot.slane %v925_v25, 5  ;;  %5099 = vmatprep.subr.bf16.mxu0 %v5821_v15 }
  0x44   : > { %5137 = vmatprep.subr.bf16.mxu1 %v5818_v53  ;;  %v944_v53 = vshrl.u32 %v6560_v30, 16  ;;  %v949_v59 = vrot.slane %v947_v61, 5 }
  0x45   : > { %v909_v17 = vrot.slane %v908_v38, 4  ;;  %v922_v35 = vor.u32 %v921_v18, %v918_v16  ;;  %v6588_v25 = vsel %vm6346_vm2, %v937_v28, %v941_v43  ;;  %v5825_v43 = vld [vmem:[%s8290_s1 + $0x50] sm:$0xff]   ;;  %v6681_v38 = vld [vmem:[%s6293_s7 + $0xe8] sm:$0xff] }
  0x46   : > { %v946_v27 = vrot.slane %v944_v53, 4  ;;  %5100 = vmatpush3.bf16.msra.mxu0 %v5823_v41  ;;  %v5824_v53 = vld [vmem:[%s8290_s1 + $0x98] sm:$0xff]   ;;  %v5827_v18 = vld [vmem:[%s8290_s1 + $0x10] sm:$0xff]   ;;  %v6662_v41 = vld [vmem:[%s6293_s7 + $0xe0] sm:$0xff]  ;;  %v1000_v50 = vshrl.u32 %v6681_v38, 16  ;;  %v1003_v21 = vshll.u32 %v6681_v38, 16 }
  0x47   : > { %5138 = vmatpush3.bf16.msra.mxu1 %v5820_v5  ;;  %v5822_v5 = vld [vmem:[%s8290_s1 + $0xd8] sm:$0xff]   ;;  %v6582_v42 = vsel %vm6346_vm2, %v909_v17, %v913_v29  ;;  %v6597_v29 = vsel %vm6442_vm5, %v4688_v63, %v1838_v12  ;;  %v923_v28 = vrot.slane %v922_v35, 4  ;;  %v5826_v12 = vld [vmem:[%s8290_s1 + $0xd0] sm:$0xff]   ;;  %5101 = vmatprep.subr.bf16.mxu0 %v5825_v43  ;;  %v4689_v43 = vrot.slane %v6356_v6, 9 }
  0x48   : > { %5139 = vmatprep.subr.bf16.mxu1 %v5822_v5  ;;  %v950_v54 = vor.u32 %v949_v59, %v946_v27  ;;  %v6602_v60 = vcombine.high %v6582_v42, %v6588_v25  ;;  %v6606_v59 = vcombine.low %v6582_v42, %v6588_v25  ;;  %v1842_v35 = vrot.slane %v6361_v10, 5  ;;  %v6665_v5 = vld [vmem:[%s6293_s7 + $0xf0] sm:$0x11] }
  0x49   : > { %v6625_v17 = vsel %vm6346_vm2, %v923_v28, %v927_v26  ;;  %v5828_v26 = vld [vmem:[%s8290_s1 + $0x90] sm:$0xff]   ;;  %v986_v16 = vshrl.u32 %v6662_v41, 16  ;;  %v989_v56 = vshll.u32 %v6662_v41, 16 }
  0x4a   : > { %8334 = vst [vmem:[#allocation12_spill] sm:$0xff] %v6602_v60  ;;  %8335 = vst [vmem:[#allocation13_spill] sm:$0xff] %v6606_v59  ;;  %v951_v63 = vrot.slane %v950_v54, 4  ;;  %1317 = vmatprep.mubr.bf16.mxu0 %v6602_v60  ;;  %v6647_v28 = vld [vmem:[%s6293_s7 + $0xd0] sm:$0x11]  ;;  %5102 = vmatpush3.bf16.msra.mxu0 %v5827_v18  ;;  %v995_v18 = vshll.u32 %v6665_v5, 16 }
  0x4b   : > { %5140 = vmatpush3.bf16.msra.mxu1 %v5824_v53  ;;  %1318 = vmatmul.mubr.bf16.gmra.mxu0 %v6606_v59  ;;  %v6644_v53 = vld [vmem:[%s6293_s7 + $0xc0] sm:$0xff]  ;;  %v967_v61 = vshll.u32 %v6647_v28, 16  ;;  %v988_v27 = vrot.slane %v986_v16, 4  ;;  %v991_v59 = vrot.slane %v989_v56, 5  ;;  %v5830_v56 = vld [vmem:[%s8290_s1 + $0xc8] sm:$0xff]  }
  0x4c   : > { %v6637_v54 = vsel %vm6346_vm2, %v951_v63, %v955_v57  ;;  %5141 = vmatprep.subr.bf16.mxu1 %v5826_v12  ;;  %v958_v10 = vshrl.u32 %v6644_v53, 16  ;;  %v961_v37 = vshll.u32 %v6644_v53, 16  ;;  %v6670_v57 = vld [vmem:[%s6293_s7 + $0xc8] sm:$0xff]  ;;  %v997_v4 = vrot.slane %v995_v18, 5 }
  0x4d   : > { %v6655_v63 = vcombine.high %v6625_v17, %v6637_v54  ;;  %v6659_v12 = vcombine.low %v6625_v17, %v6637_v54  ;;  %v969_v15 = vrot.slane %v967_v61, 5  ;;  %v975_v3 = vshll.u32 %v6670_v57, 16  ;;  %v5831_v18 = vld [vmem:[%s8290_s1 + $0x8] sm:$0xff]  }
  0x4e   : > { %v960_v45 = vrot.slane %v958_v10, 4  ;;  %v963_v46 = vrot.slane %v961_v37, 5  ;;  %v5829_v37 = vld [vmem:[%s8290_s1 + $0x48] sm:$0xff]   ;;  %v992_v10 = vor.u32 %v991_v59, %v988_v27  ;;  %v1009_v61 = vshll.u32 %v6684_v33, 16 }
  0x4f   : > { %8336 = vst [vmem:[#allocation14_spill] sm:$0xff] %v6655_v63  ;;  %8337 = vst [vmem:[#allocation15_spill] sm:$0xff] %v6659_v12  ;;  %5142 = vmatpush3.bf16.msra.mxu1 %v5828_v26  ;;  %1382 = vmatprep.mubr.bf16.mxu1 %v6655_v63  ;;  %v972_v26 = vshrl.u32 %v6670_v57, 16  ;;  %v981_v63 = vshll.u32 %v6677_v51, 16  ;;  %v1002_v59 = vrot.slane %v1000_v50, 4  ;;  %v1005_v27 = vrot.slane %v1003_v21, 5 }
  0x50   : > { %1383 = vmatmul.mubr.bf16.gmra.mxu1 %v6659_v12  ;;  %v964_v60 = vor.u32 %v963_v46, %v960_v45  ;;  %v977_v45 = vrot.slane %v975_v3, 5  ;;  %5103 = vmatprep.subr.bf16.mxu0 %v5829_v37  ;;  %v1011_v12 = vrot.slane %v1009_v61, 5  ;;  %v4637_v3 = vcombine.high %v6302_v32, %v6308_v34  ;;  %v5832_v21 = vld [vmem:[%s8290_s1 + $0x88] sm:$0xff]  }
  0x51   : > { %v974_v58 = vrot.slane %v972_v26, 4  ;;  %v983_v16 = vrot.slane %v981_v63, 5  ;;  %v993_v26 = vrot.slane %v992_v10, 4  ;;  %5143 = vmatprep.subr.bf16.mxu1 %v5830_v56  ;;  %5104 = vmatpush3.bf16.msra.mxu0 %v5831_v18  ;;  %v1006_v50 = vor.u32 %v1005_v27, %v1002_v59  ;;  %v5835_v59 = vld [vmem:[%s8290_s1] sm:$0xff]  }
  0x52   : > { %v965_v46 = vrot.slane %v964_v60, 4  ;;  %v4639_v60 = vcombine.high %v6328_v49, %v6335_v55  ;;  %v6727_v10 = vsel %vm6442_vm5, %v4689_v43, %v1842_v35  ;;  %v5834_v35 = vld [vmem:[%s8290_s1 + $0xc0] sm:$0xff]   ;;  %v4691_v27 = vrot.slane %v6422_v2, 9 }
  0x53   : > { %v978_v23 = vor.u32 %v977_v45, %v974_v58  ;;  %v6712_v63 = vsel %vm6346_vm2, %v993_v26, %v997_v4  ;;  %v8339_v58 = vrot.slane %v6416_v0, 9  ;;  %v1007_v45 = vrot.slane %v1006_v50, 4  ;;  %5144 = vmatpush3.bf16.msra.mxu1 %v5832_v21 }
  0x54   : > { %v6704_v52 = vsel %vm6346_vm2, %v965_v46, %v969_v15  ;;  %v8338_v15 = vrot.slane %v6419_v1, 5  ;;  %v5833_v1 = vld [vmem:[%s8290_s1 + $0x40] sm:$0xff]   ;;  %5145 = vmatprep.subr.bf16.mxu1 %v5834_v35  ;;  %v1862_v50 = vrot.slane %v6540_v14, 5  ;;  %v6834_v18 = vcombine.high %v6314_v36, %v6416_v0 }
  0x55   : > { %v6731_v4 = vcombine.high %v6704_v52, %v6712_v63  ;;  %v979_v61 = vrot.slane %v978_v23, 4  ;;  %v6735_v56 = vcombine.low %v6704_v52, %v6712_v63  ;;  %5105 = vmatprep.subr.bf16.mxu0 %v5833_v1  ;;  %v5838_v1 = vld [vmem:[%s8290_s1 + $0x2f8] sm:$0xff]   ;;  %v4638_v43 = vcombine.low %v6328_v49, %v6335_v55 }
  0x56   : > { %v6723_v37 = vsel %vm6442_vm5, %v8339_v58, %v8338_v15  ;;  %v6770_v15 = vsel %vm6346_vm2, %v1007_v45, %v1011_v12  ;;  %v1850_v58 = vrot.slane %v6429_v8, 5  ;;  %5106 = vmatpush3.bf16.msra.mxu0 %v5835_v59  ;;  %v5837_v8 = vld [vmem:[%s8290_s1 + $0x278] sm:$0xff]   ;;  %v4692_v45 = vrot.slane %v6523_v7, 9  ;;  %8344 = vst [vmem:[#allocation20_spill] sm:$0xff] %v6834_v18 }
  0x57   : > { %8340 = vst [vmem:[#allocation16_spill] sm:$0xff] %v6731_v4  ;;  %8341 = vst [vmem:[#allocation17_spill] sm:$0xff] %v6735_v56  ;;  %v6742_v46 = vcombine.high %v6597_v29, %v6723_v37  ;;  %v6749_v23 = vcombine.low %v6597_v29, %v6723_v37  ;;  %1325 = vmatprep.mubr.bf16.mxu0 %v6731_v4  ;;  %v6758_v26 = vsel %vm6346_vm2, %v979_v61, %v983_v16  ;;  %v5836_v16 = vld [vmem:[%s8290_s1 + $0x80] sm:$0xff]   ;;  %v5854_v4 = vld [vmem:[%s8290_s1 + $0x2d8] sm:$0xff]  }
  0x58   : > { %1326 = vmatmul.mubr.bf16.gmra.mxu0 %v6735_v56  ;;  %v6783_v21 = vcombine.high %v6758_v26, %v6770_v15  ;;  %v6787_v12 = vcombine.low %v6758_v26, %v6770_v15  ;;  %5146 = vmatpush3.bf16.msra.mxu1 %v5836_v16  ;;  %v6800_v61 = vsel %vm6442_vm5, %v4691_v27, %v1850_v58  ;;  %v4694_v27 = vrot.slane %v6537_v13, 9  ;;  %v5844_v56 = vld [vmem:[%s8290_s1 + $0x2b0] sm:$0xff]  }
  0x59   : > { %1703 = vmatprep.mubr.bf16.mxu0 %v4637_v3  ;;  %v1854_v3 = vrot.slane %v6526_v9, 5  ;;  %5171 = vmatprep.subr.bf16.mxu0 %v5837_v8  ;;  %v6810_v16 = vcombine.high %v6727_v10, %v6800_v61  ;;  %v6814_v35 = vcombine.low %v6727_v10, %v6800_v61  ;;  %v4636_v58 = vcombine.low %v6302_v32, %v6308_v34  ;;  %v5839_v9 = vld [vmem:[%s8290_s1 + $0x238] sm:$0xff]  }
  0x5a   : > { %8342 = vst [vmem:[#allocation18_spill] sm:$0xff] %v6783_v21  ;;  %8343 = vst [vmem:[#allocation19_spill] sm:$0xff] %v6787_v12  ;;  %1390 = vmatprep.mubr.bf16.mxu1 %v6783_v21  ;;  %5211 = vmatprep.subr.bf16.mxu1 %v5838_v1  ;;  %v4693_v32 = vrot.slane %v6553_v22, 9  ;;  %v5841_v1 = vld [vmem:[%s8290_s1 + $0x270] sm:$0xff]   ;;  %v6842_v14 = vsel %vm6442_vm5, %v4694_v27, %v1862_v50  ;;  %v5840_v50 = vld [vmem:[%s8290_s1 + $0x2b8] sm:$0xff]   ;;  %v1866_v27 = vrot.slane %v6563_v31, 5 }
  0x5b   : > { %1391 = vmatmul.mubr.bf16.gmra.mxu1 %v6787_v12  ;;  %v6824_v8 = vsel %vm6442_vm5, %v4692_v45, %v1854_v3  ;;  %v4695_v3 = vrot.slane %v6560_v30, 9  ;;  %v5843_v12 = vld [vmem:[%s8290_s1 + $0x230] sm:$0xff]   ;;  %v6917_v21 = vcombine.high %v6523_v7, %v6537_v13 }
  0x5c   : > { %1768 = vmatprep.mubr.bf16.mxu1 %v4639_v60  ;;  %v1858_v60 = vrot.slane %v6556_v24, 5  ;;  %v6847_v45 = vcombine.high %v6824_v8, %v6842_v14  ;;  %v6852_v59 = vcombine.low %v6824_v8, %v6842_v14  ;;  %v5842_v31 = vld [vmem:[%s8290_s1 + $0x2f0] sm:$0xff]  }
  0x5d   : > { %8348 = vst [vmem:[#allocation24_spill] sm:$0xff] %v6917_v21 }
  0x5e   : > { %v6861_v24 = vsel %vm6442_vm5, %v4693_v32, %v1858_v60  ;;  %v6883_v32 = vsel %vm6442_vm5, %v4695_v3, %v1866_v27  ;;  %v6903_v3 = vcombine.low %v6314_v36, %v6416_v0  ;;  %v5846_v27 = vld [vmem:[%s8290_s1 + $0x2e8] sm:$0xff]  }
  0x5f   : > { %8345 = vst [vmem:[#allocation21_spill] sm:$0xff] %v6861_v24  ;;  %v6899_v49 = vcombine.low %v6861_v24, %v6883_v32  ;;  %v5847_v60 = vld [vmem:[%s8290_s1 + $0x228] sm:$0xff]  }
  0x60   : > { %1704 = vmatmul.mubr.bf16.vlgmr.msra.gmra.mxu0 %v4636_v58  ;;  %v6895_v58 = vcombine.high %v6861_v24, %v6883_v32  ;;  %8347 = vst [vmem:[#allocation23_spill] sm:$0xff] %v6903_v3  ;;  %v6973_v24 = vcombine.high %v6644_v53, %v6662_v41 }
  0x61   : > { %5172 = vmatpush3.bf16.msra.mxu0 %v5839_v9  ;;  %1711 = vmatprep.mubr.bf16.mxu0 %v6834_v18  ;;  %v6879_v9 = vcombine.high %v6356_v6, %v6422_v2  ;;  %v1870_v18 = vrot.slane %v6647_v28, 5  ;;  %v6958_v28 = vcombine.low %v6523_v7, %v6537_v13 }
  0x62   : > { %5173 = vmatprep.subr.bf16.mxu0 %v5841_v1  ;;  %v5845_v1 = vld [vmem:[%s8290_s1 + $0x268] sm:$0xff]  }
  0x63   : > { %8346 = vst [vmem:[#allocation22_spill] sm:$0xff] %v6879_v9  ;;  %1769 = vmatmul.mubr.bf16.vlgmr.msra.gmra.mxu1 %v4638_v43  ;;  %v5849_v43 = vld [vmem:[%s8290_s1 + $0x260] sm:$0xff]   ;;  %8351 = vst [vmem:[#allocation27_spill] sm:$0xff] %v6958_v28 }
  0x64   : > { %5212 = vmatpush3.bf16.msra.mxu1 %v5840_v50  ;;  %1776 = vmatprep.mubr.bf16.mxu1 %v6879_v9  ;;  %v5848_v50 = vld [vmem:[%s8290_s1 + $0x2a8] sm:$0xff]   ;;  %v1874_v9 = vrot.slane %v6677_v51, 5  ;;  %v6978_v51 = vcombine.low %v6553_v22, %v6560_v30 }
  0x65   : > { %5174 = vmatpush3.bf16.msra.mxu0 %v5843_v12  ;;  %5213 = vmatprep.subr.bf16.mxu1 %v5842_v31  ;;  %v6922_v12 = vcombine.low %v6356_v6, %v6422_v2  ;;  %v5851_v31 = vld [vmem:[%s8290_s1 + $0x220] sm:$0xff]  }
  0x66   : > { %5175 = vmatprep.subr.bf16.mxu0 %v5845_v1  ;;  %v4696_v1 = vrot.slane %v6644_v53, 9 }
  0x67   : > { %8349 = vst [vmem:[#allocation25_spill] sm:$0xff] %v6922_v12 }
  0x68   : > { %1712 = vmatmul.mubr.bf16.gmra.mxu0 %v6903_v3  ;;  %5214 = vmatpush3.bf16.msra.mxu1 %v5844_v56  ;;  %v5850_v56 = vld [vmem:[%s8290_s1 + $0x2e0] sm:$0xff]  }
  0x69   : > { %5176 = vmatpush3.bf16.msra.mxu0 %v5847_v60  ;;  %5215 = vmatprep.subr.bf16.mxu1 %v5846_v27  ;;  %v6942_v60 = vcombine.high %v6553_v22, %v6560_v30  ;;  %v5852_v3 = vld [vmem:[%s8290_s1 + $0x2a0] sm:$0xff]   ;;  %v5853_v27 = vld [vmem:[%s8290_s1 + $0x258] sm:$0xff]  }
  0x6a   : > { %5177 = vmatprep.subr.bf16.mxu0 %v5849_v43  ;;  %1719 = vmatprep.mubr.bf16.mxu0 %v6917_v21  ;;  %v4697_v43 = vrot.slane %v6670_v57, 9  ;;  %v5855_v21 = vld [vmem:[%s8290_s1 + $0x218] sm:$0xff]  }
  0x6b   : > { %8350 = vst [vmem:[#allocation26_spill] sm:$0xff] %v6942_v60  ;;  %1777 = vmatmul.mubr.bf16.gmra.mxu1 %v6922_v12  ;;  %v5857_v12 = vld [vmem:[%s8290_s1 + $0x250] sm:$0xff]  }
  0x6c   : > { %5216 = vmatpush3.bf16.msra.mxu1 %v5848_v50  ;;  %1784 = vmatprep.mubr.bf16.mxu1 %v6942_v60  ;;  %v5856_v50 = vld [vmem:[%s8290_s1 + $0x298] sm:$0xff]   ;;  %v7034_v60 = vcombine.low %v6670_v57, %v6681_v38 }
  0x6d   : > { %5178 = vmatpush3.bf16.msra.mxu0 %v5851_v31  ;;  %5217 = vmatprep.subr.bf16.mxu1 %v5850_v56  ;;  %v6985_v31 = vsel %vm6442_vm5, %v4696_v1, %v1870_v18  ;;  %v6989_v56 = vsel %vm6442_vm5, %v4697_v43, %v1874_v9  ;;  %v5858_v9 = vld [vmem:[%s8290_s1 + $0x2d0] sm:$0xff]   ;;  %v5862_v43 = vld [vmem:[%s8290_s1 + $0x2c8] sm:$0xff]   ;;  %v5865_v18 = vld [vmem:[%s8290_s1 + $0x240] sm:$0xff]  }
  0x6e   : > { %5179 = vmatprep.subr.bf16.mxu0 %v5853_v27  ;;  %v5859_v27 = vld [vmem:[%s8290_s1 + $0x210] sm:$0xff]   ;;  %8352 = vst [vmem:[#allocation28_spill] sm:$0xff] %v7034_v60 }
  0x6f   : > { %v5860_v1 = vld [vmem:[%s8290_s1 + $0x290] sm:$0xff]  }
  0x70   : > { %1720 = vmatmul.mubr.bf16.gmra.mxu0 %v6958_v28  ;;  %5218 = vmatpush3.bf16.msra.mxu1 %v5852_v3  ;;  %v5863_v3 = vld [vmem:[%s8290_s1 + $0x208] sm:$0xff]   ;;  %v8353_v28 = vcombine.high %v6462_v39, %v6466_v40 }
  0x71   : > { %5180 = vmatpush3.bf16.msra.mxu0 %v5855_v21  ;;  %5219 = vmatprep.subr.bf16.mxu1 %v5854_v4  ;;  %v7005_v21 = vcombine.high %v6670_v57, %v6681_v38  ;;  %v5861_v4 = vld [vmem:[%s8290_s1 + $0x248] sm:$0xff]  }
  0x72   : > { %5181 = vmatprep.subr.bf16.mxu0 %v5857_v12  ;;  %1727 = vmatprep.mubr.bf16.mxu0 %v6973_v24  ;;  %v7019_v12 = vcombine.low %v6644_v53, %v6662_v41 }
  0x73   : > { %1785 = vmatmul.mubr.bf16.gmra.mxu1 %v6978_v51 }
  0x74   : > { %5220 = vmatpush3.bf16.msra.mxu1 %v5856_v50  ;;  %1792 = vmatprep.mubr.bf16.mxu1 %v7005_v21  ;;  %v5864_v50 = vld [vmem:[%s8290_s1 + $0x288] sm:$0xff]  }
  0x75   : > { %5182 = vmatpush3.bf16.msra.mxu0 %v5859_v27  ;;  %5221 = vmatprep.subr.bf16.mxu1 %v5858_v9  ;;  %v5867_v27 = vld [vmem:[%s8290_s1 + $0x200] sm:$0xff]  }
  0x76   : > { %5183 = vmatprep.subr.bf16.mxu0 %v5861_v4  ;;  %v5866_v9 = vld [vmem:[%s8290_s1 + $0x2c0] sm:$0xff]  }
  0x77   : > { %v5868_v4 = vld [vmem:[%s8290_s1 + $0x280] sm:$0xff]  }
  0x78   : > { %1728 = vmatmul.mubr.bf16.gmra.mxu0 %v7019_v12  ;;  %5222 = vmatpush3.bf16.msra.mxu1 %v5860_v1  ;;  %v5871_v1 = vld [vmem:[%s8290_s1 + $0x338] sm:$0xff]  }
  0x79   : > { %5184 = vmatpush3.bf16.msra.mxu0 %v5863_v3  ;;  %5223 = vmatprep.subr.bf16.mxu1 %v5862_v43  ;;  %v5869_v3 = vld [vmem:[%s8290_s1 + $0x378] sm:$0xff]   ;;  %v5873_v43 = vld [vmem:[%s8290_s1 + $0x370] sm:$0xff]  }
  0x7a   : > { %5185 = vmatprep.subr.bf16.mxu0 %v5865_v18  ;;  %2172 = vmatprep.mubr.bf16.mxu0 %v8353_v28  ;;  %v5870_v18 = vld [vmem:[%s8290_s1 + $0x3f8] sm:$0xff]   ;;  %v8354_v28 = vcombine.high %v6485_v47, %v6532_v11 }
  0x7b   : > { %1793 = vmatmul.mubr.bf16.gmra.mxu1 %v7034_v60  ;;  %v8355_v60 = vcombine.low %v6462_v39, %v6466_v40  ;;  %v5876_v39 = vld [vmem:[%s8290_s1 + $0x3b0] sm:$0xff]  }
  0x7c   : > { %5224 = vmatpush3.bf16.msra.mxu1 %v5864_v50  ;;  %2237 = vmatprep.mubr.bf16.mxu1 %v8354_v28  ;;  %v5872_v50 = vld [vmem:[%s8290_s1 + $0x3b8] sm:$0xff]   ;;  %v5880_v28 = vld [vmem:[%s8290_s1 + $0x3a8] sm:$0xff]  }
  0x7d   : > { %5186 = vmatpush3.bf16.msra.mxu0 %v5867_v27  ;;  %5225 = vmatprep.subr.bf16.mxu1 %v5866_v9  ;;  %v5875_v27 = vld [vmem:[%s8290_s1 + $0x330] sm:$0xff]  }
  0x7e   : > { %5251 = vmatprep.subr.bf16.mxu0 %v5869_v3  ;;  %v5874_v9 = vld [vmem:[%s8290_s1 + $0x3f0] sm:$0xff]   ;;  %v5878_v3 = vld [vmem:[%s8290_s1 + $0x3e8] sm:$0xff]  }
  0x80   : > { %2173 = vmatmul.mubr.bf16.vlgmr.msra.gmra.mxu0 %v8355_v60  ;;  %5226 = vmatpush3.bf16.msra.mxu1 %v5868_v4  ;;  %v5877_v60 = vld [vmem:[%s8290_s1 + $0x368] sm:$0xff]   ;;  %v8356_v4 = vcombine.low %v6485_v47, %v6532_v11  ;;  %v4698_v47 = vrot.slane %v6662_v41, 9  ;;  %v5882_v41 = vld [vmem:[%s8290_s1 + $0x3e0] sm:$0xff]  }
  0x81   : > { %5252 = vmatpush3.bf16.msra.mxu0 %v5871_v1  ;;  %5291 = vmatprep.subr.bf16.mxu1 %v5870_v18  ;;  %v5879_v18 = vld [vmem:[%s8290_s1 + $0x328] sm:$0xff]   ;;  %v5881_v1 = vld [vmem:[%s8290_s1 + $0x360] sm:$0xff]  }
  0x82   : > { %5253 = vmatprep.subr.bf16.mxu0 %v5873_v43  ;;  %2180 = vmatprep.mubr.bf16.mxu0 %v6742_v46  ;;  %v1878_v43 = vrot.slane %v6665_v5, 5  ;;  %v5885_v5 = vld [vmem:[%s8290_s1 + $0x358] sm:$0xff]  }
  0x83   : > { %2238 = vmatmul.mubr.bf16.vlgmr.msra.gmra.mxu1 %v8356_v4  ;;  %v5887_v4 = vld [vmem:[%s8290_s1 + $0x318] sm:$0xff]  }
  0x84   : > { %5292 = vmatpush3.bf16.msra.mxu1 %v5872_v50  ;;  %2245 = vmatprep.mubr.bf16.mxu1 %v6810_v16  ;;  %v5883_v50 = vld [vmem:[%s8290_s1 + $0x320] sm:$0xff]  }
  0x85   : > { %5254 = vmatpush3.bf16.msra.mxu0 %v5875_v27  ;;  %5293 = vmatprep.subr.bf16.mxu1 %v5874_v9  ;;  %v4699_v27 = vrot.slane %v6681_v38, 9  ;;  %v5884_v9 = vld [vmem:[%s8290_s1 + $0x3a0] sm:$0xff]   ;;  %v7126_v38 = vsel %vm6442_vm5, %v4698_v47, %v1878_v43  ;;  %v5891_v47 = vld [vmem:[%s8290_s1 + $0x310] sm:$0xff]  }
  0x86   : > { %5255 = vmatprep.subr.bf16.mxu0 %v5877_v60  ;;  %v5886_v60 = vld [vmem:[%s8290_s1 + $0x3d8] sm:$0xff]  }
  0x88   : > { %2181 = vmatmul.mubr.bf16.gmra.mxu0 %v6749_v23  ;;  %5294 = vmatpush3.bf16.msra.mxu1 %v5876_v39  ;;  %v1882_v39 = vrot.slane %v6684_v33, 5  ;;  %v5889_v33 = vld [vmem:[%s8290_s1 + $0x350] sm:$0xff]  }
  0x89   : > { %5256 = vmatpush3.bf16.msra.mxu0 %v5879_v18  ;;  %5295 = vmatprep.subr.bf16.mxu1 %v5878_v3  ;;  %v7137_v3 = vcombine.high %v6985_v31, %v7126_v38 }
  0x8a   : > { %5257 = vmatprep.subr.bf16.mxu0 %v5881_v1  ;;  %2188 = vmatprep.mubr.bf16.mxu0 %v6847_v45  ;;  %v7141_v18 = vsel %vm6442_vm5, %v4699_v27, %v1882_v39  ;;  %v5888_v1 = vld [vmem:[%s8290_s1 + $0x398] sm:$0xff]   ;;  %v7167_v27 = vcombine.low %v6985_v31, %v7126_v38  ;;  %v5897_v39 = vld [vmem:[%s8290_s1 + $0x340] sm:$0xff]  }
  0x8b   : > { %2246 = vmatmul.mubr.bf16.gmra.mxu1 %v6814_v35  ;;  %v7155_v43 = vcombine.high %v6989_v56, %v7141_v18 }
  0x8c   : > { %5296 = vmatpush3.bf16.msra.mxu1 %v5880_v28  ;;  %2253 = vmatprep.mubr.bf16.mxu1 %v6895_v58  ;;  %v5890_v28 = vld [vmem:[%s8290_s1 + $0x3d0] sm:$0xff]  }
  0x8d   : > { %5258 = vmatpush3.bf16.msra.mxu0 %v5883_v50  ;;  %5297 = vmatprep.subr.bf16.mxu1 %v5882_v41  ;;  %v5892_v50 = vld [vmem:[%s8290_s1 + $0x390] sm:$0xff]   ;;  %v5893_v41 = vld [vmem:[%s8290_s1 + $0x348] sm:$0xff]  }
  0x8e   : > { %5259 = vmatprep.subr.bf16.mxu0 %v5885_v5  ;;  %v5895_v5 = vld [vmem:[%s8290_s1 + $0x308] sm:$0xff]  }
  0x90   : > { %2189 = vmatmul.mubr.bf16.gmra.mxu0 %v6852_v59  ;;  %5298 = vmatpush3.bf16.msra.mxu1 %v5884_v9  ;;  %v5894_v9 = vld [vmem:[%s8290_s1 + $0x3c8] sm:$0xff]  }
  0x91   : > { %5260 = vmatpush3.bf16.msra.mxu0 %v5887_v4  ;;  %5299 = vmatprep.subr.bf16.mxu1 %v5886_v60  ;;  %v7182_v60 = vcombine.low %v6989_v56, %v7141_v18  ;;  %v5896_v4 = vld [vmem:[%s8290_s1 + $0x388] sm:$0xff]  }
  0x92   : > { %5261 = vmatprep.subr.bf16.mxu0 %v5889_v33  ;;  %2196 = vmatprep.mubr.bf16.mxu0 %v7137_v3  ;;  %v5899_v33 = vld [vmem:[%s8290_s1 + $0x300] sm:$0xff]  }
  0x93   : > { %2254 = vmatmul.mubr.bf16.gmra.mxu1 %v6899_v49 }
  0x94   : > { %5300 = vmatpush3.bf16.msra.mxu1 %v5888_v1  ;;  %2261 = vmatprep.mubr.bf16.mxu1 %v7155_v43  ;;  %v5898_v1 = vld [vmem:[%s8290_s1 + $0x3c0] sm:$0xff]  }
  0x95   : > { %5262 = vmatpush3.bf16.msra.mxu0 %v5891_v47  ;;  %5301 = vmatprep.subr.bf16.mxu1 %v5890_v28  ;;  %v5900_v47 = vld [vmem:[%s8290_s1 + $0x380] sm:$0xff]   ;;  %v8357_v28 = vcombine.high %v6308_v34, %v6314_v36 }
  0x96   : > { %5263 = vmatprep.subr.bf16.mxu0 %v5893_v41  ;;  %v5902_v41 = vld [vmem:[%s8290_s1 + $0x4f8] sm:$0xff]  }
  0x98   : > { %2197 = vmatmul.mubr.bf16.gmra.mxu0 %v7167_v27  ;;  %5302 = vmatpush3.bf16.msra.mxu1 %v5892_v50  ;;  %v5901_v50 = vld [vmem:[%s8290_s1 + $0x478] sm:$0xff]  }
  0x99   : > { %5264 = vmatpush3.bf16.msra.mxu0 %v5895_v5  ;;  %5303 = vmatprep.subr.bf16.mxu1 %v5894_v9  ;;  %v5903_v9 = vld [vmem:[%s8290_s1 + $0x438] sm:$0xff]   ;;  %v8358_v5 = vcombine.high %v6335_v55, %v6356_v6 }
  0x9a   : > { %5265 = vmatprep.subr.bf16.mxu0 %v5897_v39  ;;  %2540 = vmatprep.mubr.bf16.mxu0 %v8357_v28  ;;  %v5905_v39 = vld [vmem:[%s8290_s1 + $0x470] sm:$0xff]   ;;  %v8359_v28 = vcombine.low %v6308_v34, %v6314_v36  ;;  %v8360_v36 = vcombine.high %v6416_v0, %v6523_v7 }
  0x9b   : > { %2262 = vmatmul.mubr.bf16.gmra.mxu1 %v7182_v60  ;;  %v5908_v34 = vld [vmem:[%s8290_s1 + $0x4b0] sm:$0xff]  }
  0x9c   : > { %5304 = vmatpush3.bf16.msra.mxu1 %v5896_v4  ;;  %2605 = vmatprep.mubr.bf16.mxu1 %v8358_v5  ;;  %v5904_v4 = vld [vmem:[%s8290_s1 + $0x4b8] sm:$0xff]   ;;  %v8362_v5 = vcombine.high %v6422_v2, %v6553_v22 }
  0x9d   : > { %5266 = vmatpush3.bf16.msra.mxu0 %v5899_v33  ;;  %5305 = vmatprep.subr.bf16.mxu1 %v5898_v1  ;;  %v5907_v33 = vld [vmem:[%s8290_s1 + $0x430] sm:$0xff]  }
  0x9e   : > { %5331 = vmatprep.subr.bf16.mxu0 %v5901_v50  ;;  %v5906_v1 = vld [vmem:[%s8290_s1 + $0x4f0] sm:$0xff]   ;;  %v8361_v50 = vcombine.low %v6335_v55, %v6356_v6  ;;  %v5913_v55 = vld [vmem:[%s8290_s1 + $0x460] sm:$0xff]   ;;  %v8363_v6 = vcombine.low %v6416_v0, %v6523_v7  ;;  %v8364_v7 = vcombine.high %v6537_v13, %v6644_v53 }
  0x9f   : > { %v5916_v0 = vld [vmem:[%s8290_s1 + $0x4a0] sm:$0xff]  }
  0xa0   : > { %2541 = vmatmul.mubr.bf16.vlgmr.msra.gmra.mxu0 %v8359_v28  ;;  %5306 = vmatpush3.bf16.msra.mxu1 %v5900_v47  ;;  %v5909_v47 = vld [vmem:[%s8290_s1 + $0x468] sm:$0xff]   ;;  %v5915_v28 = vld [vmem:[%s8290_s1 + $0x420] sm:$0xff]  }
  0xa1   : > { %5332 = vmatpush3.bf16.msra.mxu0 %v5903_v9  ;;  %5371 = vmatprep.subr.bf16.mxu1 %v5902_v41  ;;  %v5910_v41 = vld [vmem:[%s8290_s1 + $0x4e8] sm:$0xff]  }
  0xa2   : > { %5333 = vmatprep.subr.bf16.mxu0 %v5905_v39  ;;  %2548 = vmatprep.mubr.bf16.mxu0 %v8360_v36  ;;  %v5911_v9 = vld [vmem:[%s8290_s1 + $0x428] sm:$0xff]   ;;  %v5919_v36 = vld [vmem:[%s8290_s1 + $0x418] sm:$0xff]  }
  0xa3   : > { %2606 = vmatmul.mubr.bf16.vlgmr.msra.gmra.mxu1 %v8361_v50  ;;  %v5912_v39 = vld [vmem:[%s8290_s1 + $0x4a8] sm:$0xff]   ;;  %v5920_v50 = vld [vmem:[%s8290_s1 + $0x498] sm:$0xff]  }
  0xa4   : > { %5372 = vmatpush3.bf16.msra.mxu1 %v5904_v4  ;;  %2613 = vmatprep.mubr.bf16.mxu1 %v8362_v5  ;;  %v5914_v4 = vld [vmem:[%s8290_s1 + $0x4e0] sm:$0xff]   ;;  %v5923_v5 = vld [vmem:[%s8290_s1 + $0x410] sm:$0xff]  }
  0xa5   : > { %5334 = vmatpush3.bf16.msra.mxu0 %v5907_v33  ;;  %5373 = vmatprep.subr.bf16.mxu1 %v5906_v1  ;;  %v5917_v33 = vld [vmem:[%s8290_s1 + $0x458] sm:$0xff]   ;;  %v8365_v1 = vcombine.low %v6422_v2, %v6553_v22  ;;  %v5921_v2 = vld [vmem:[%s8290_s1 + $0x450] sm:$0xff]   ;;  %v8367_v22 = vcombine.low %v6537_v13, %v6644_v53  ;;  %v6062_v53 = vld [vmem:[%s6293_s7 + $0xe8] sm:$0xff] }
  0xa6   : > { %5335 = vmatprep.subr.bf16.mxu0 %v5909_v47  ;;  %v8366_v47 = vcombine.high %v6560_v30, %v6670_v57  ;;  %v5922_v13 = vld [vmem:[%s8290_s1 + $0x4d0] sm:$0xff]  }
  0xa8   : > { %2549 = vmatmul.mubr.bf16.gmra.mxu0 %v8363_v6  ;;  %5374 = vmatpush3.bf16.msra.mxu1 %v5908_v34  ;;  %v5918_v34 = vld [vmem:[%s8290_s1 + $0x4d8] sm:$0xff]  }
  0xa9   : > { %5336 = vmatpush3.bf16.msra.mxu0 %v5911_v9  ;;  %5375 = vmatprep.subr.bf16.mxu1 %v5910_v41  ;;  %v7294_v41 = vld [vmem:[%s6293_s7 + $0x100] sm:$0xff]  ;;  %v7297_v9 = vld [vmem:[%s6293_s7 + $0x108] sm:$0xff] }
  0xaa   : > { %5337 = vmatprep.subr.bf16.mxu0 %v5913_v55  ;;  %2556 = vmatprep.mubr.bf16.mxu0 %v8364_v7  ;;  %v6061_v55 = vld [vmem:[%s6293_s7 + $0xe0] sm:$0xff] }
  0xab   : > { %2614 = vmatmul.mubr.bf16.gmra.mxu1 %v8365_v1  ;;  %v4761_v6 = vcombine.high %v6061_v55, %v7294_v41  ;;  %v4760_v7 = vcombine.low %v6061_v55, %v7294_v41  ;;  %v5927_v1 = vld [vmem:[%s8290_s1 + $0x408] sm:$0xff]   ;;  %v5934_v55 = vld [vmem:[%s8290_s1 + $0x5f8] sm:$0xff]  }
  0xac   : > { %5376 = vmatpush3.bf16.msra.mxu1 %v5912_v39  ;;  %2621 = vmatprep.mubr.bf16.mxu1 %v8366_v47  ;;  %v4763_v39 = vcombine.high %v6062_v53, %v7297_v9  ;;  %v5930_v47 = vld [vmem:[%s8290_s1 + $0x4c0] sm:$0xff]  }
  0xad   : > { %5338 = vmatpush3.bf16.msra.mxu0 %v5915_v28  ;;  %5377 = vmatprep.subr.bf16.mxu1 %v5914_v4  ;;  %v5924_v28 = vld [vmem:[%s8290_s1 + $0x490] sm:$0xff]   ;;  %v5925_v4 = vld [vmem:[%s8290_s1 + $0x448] sm:$0xff]  }
  0xae   : > { %5339 = vmatprep.subr.bf16.mxu0 %v5917_v33  ;;  %v5926_v33 = vld [vmem:[%s8290_s1 + $0x4c8] sm:$0xff]  }
  0xb0   : > { %2557 = vmatmul.mubr.bf16.gmra.mxu0 %v8367_v22  ;;  %5378 = vmatpush3.bf16.msra.mxu1 %v5916_v0  ;;  %v8368_v0 = vcombine.low %v6560_v30, %v6670_v57  ;;  %v4762_v30 = vcombine.low %v6062_v53, %v7297_v9  ;;  %v5928_v57 = vld [vmem:[%s8290_s1 + $0x488] sm:$0xff]   ;;  %v8369_v22 = vld [vmem:[#allocation5_spill] sm:$0xff]  ;;  %v8372_v53 = vld [vmem:[#allocation7_spill] sm:$0xff] }
  0xb1   : > { %5340 = vmatpush3.bf16.msra.mxu0 %v5919_v36  ;;  %5379 = vmatprep.subr.bf16.mxu1 %v5918_v34  ;;  %v5929_v34 = vld [vmem:[%s8290_s1 + $0x440] sm:$0xff]  }
  0xb2   : > { %5341 = vmatprep.subr.bf16.mxu0 %v5921_v2  ;;  %2564 = vmatprep.mubr.bf16.mxu0 %v4761_v6  ;;  %v5931_v36 = vld [vmem:[%s8290_s1 + $0x400] sm:$0xff]   ;;  %v5935_v6 = vld [vmem:[%s8290_s1 + $0x538] sm:$0xff]  }
  0xb3   : > { %2622 = vmatmul.mubr.bf16.gmra.mxu1 %v8368_v0  ;;  %v5932_v2 = vld [vmem:[%s8290_s1 + $0x480] sm:$0xff]   ;;  %v5936_v0 = vld [vmem:[%s8290_s1 + $0x5b8] sm:$0xff]  }
  0xb4   : > { %5380 = vmatpush3.bf16.msra.mxu1 %v5920_v50  ;;  %2629 = vmatprep.mubr.bf16.mxu1 %v4763_v39  ;;  %v8370_v50 = vcombine.high %v6371_v19, %v8369_v22 }
  0xb5   : > { %5342 = vmatpush3.bf16.msra.mxu0 %v5923_v5  ;;  %5381 = vmatprep.subr.bf16.mxu1 %v5922_v13  ;;  %v5933_v5 = vld [vmem:[%s8290_s1 + $0x578] sm:$0xff]   ;;  %v8371_v13 = vld [vmem:[#allocation6_spill] sm:$0xff] }
  0xb6   : > { %5343 = vmatprep.subr.bf16.mxu0 %v5925_v4  ;;  %v8373_v39 = vcombine.high %v8371_v13, %v8372_v53  ;;  %v8374_v4 = vcombine.low %v6371_v19, %v8369_v22  ;;  %v2650_v19 = vshll.u32 %v7294_v41, 16  ;;  %v2664_v22 = vshll.u32 %v7297_v9, 16 }
  0xb8   : > { %2565 = vmatmul.mubr.bf16.gmra.mxu0 %v4760_v7  ;;  %5382 = vmatpush3.bf16.msra.mxu1 %v5924_v28  ;;  %v5937_v28 = vld [vmem:[%s8290_s1 + $0x570] sm:$0xff]  }
  0xb9   : > { %5344 = vmatpush3.bf16.msra.mxu0 %v5927_v1  ;;  %5383 = vmatprep.subr.bf16.mxu1 %v5926_v33  ;;  %v5939_v7 = vld [vmem:[%s8290_s1 + $0x530] sm:$0xff]   ;;  %v2647_v33 = vshrl.u32 %v7294_v41, 16 }
  0xba   : > { %5345 = vmatprep.subr.bf16.mxu0 %v5929_v34  ;;  %2934 = vmatprep.mubr.bf16.mxu0 %v8370_v50  ;;  %v5938_v1 = vld [vmem:[%s8290_s1 + $0x5f0] sm:$0xff]   ;;  %v5943_v50 = vld [vmem:[%s8290_s1 + $0x528] sm:$0xff]  }
  0xbb   : > { %2630 = vmatmul.mubr.bf16.gmra.mxu1 %v4762_v30  ;;  %v5940_v34 = vld [vmem:[%s8290_s1 + $0x5b0] sm:$0xff]   ;;  %v8375_v30 = vcombine.high %v6489_v48, %v6582_v42 }
  0xbc   : > { %5384 = vmatpush3.bf16.msra.mxu1 %v5928_v57  ;;  %2999 = vmatprep.mubr.bf16.mxu1 %v8373_v39  ;;  %v5941_v57 = vld [vmem:[%s8290_s1 + $0x568] sm:$0xff]   ;;  %v8378_v39 = vcombine.low %v6489_v48, %v6582_v42  ;;  %v5948_v48 = vld [vmem:[%s8290_s1 + $0x5a0] sm:$0xff]   ;;  %v8379_v42 = vcombine.high %v6588_v25, %v6704_v52 }
  0xbd   : > { %5346 = vmatpush3.bf16.msra.mxu0 %v5931_v36  ;;  %5385 = vmatprep.subr.bf16.mxu1 %v5930_v47  ;;  %v2661_v36 = vshrl.u32 %v7297_v9, 16  ;;  %v8376_v47 = vcombine.low %v8371_v13, %v8372_v53  ;;  %v2652_v13 = vrot.slane %v2650_v19, 5  ;;  %v8380_v19 = vcombine.low %v6501_v44, %v6625_v17 }
  0xbe   : > { %5411 = vmatprep.subr.bf16.mxu0 %v5933_v5  ;;  %v8377_v5 = vcombine.high %v6501_v44, %v6625_v17  ;;  %v5953_v44 = vld [vmem:[%s8290_s1 + $0x550] sm:$0xff]   ;;  %v5952_v17 = vld [vmem:[%s8290_s1 + $0x598] sm:$0xff]  }
  0xbf   : > { %v2663_v53 = vrot.slane %v2661_v36, 4  ;;  %v8381_v36 = vcombine.high %v6637_v54, %v6758_v26 }
  0xc0   : > { %2935 = vmatmul.mubr.bf16.vlgmr.msra.gmra.mxu0 %v8374_v4  ;;  %5386 = vmatpush3.bf16.msra.mxu1 %v5932_v2  ;;  %v5942_v2 = vld [vmem:[%s8290_s1 + $0x5e8] sm:$0xff]   ;;  %v2666_v4 = vrot.slane %v2664_v22, 5  ;;  %v5955_v22 = vld [vmem:[%s8290_s1 + $0x510] sm:$0xff]  }
  0xc1   : > { %5412 = vmatpush3.bf16.msra.mxu0 %v5935_v6  ;;  %5451 = vmatprep.subr.bf16.mxu1 %v5934_v55  ;;  %v5945_v55 = vld [vmem:[%s8290_s1 + $0x560] sm:$0xff]   ;;  %v2649_v6 = vrot.slane %v2647_v33, 4  ;;  %v5949_v33 = vld [vmem:[%s8290_s1 + $0x558] sm:$0xff]  }
  0xc2   : > { %5413 = vmatprep.subr.bf16.mxu0 %v5937_v28  ;;  %2942 = vmatprep.mubr.bf16.mxu0 %v8375_v30  ;;  %v5944_v28 = vld [vmem:[%s8290_s1 + $0x5a8] sm:$0xff]   ;;  %v2667_v30 = vor.u32 %v2666_v4, %v2663_v53  ;;  %v8383_v53 = vcombine.low %v6637_v54, %v6758_v26 }
  0xc3   : > { %3000 = vmatmul.mubr.bf16.vlgmr.msra.gmra.mxu1 %v8376_v47  ;;  %v5959_v26 = vld [vmem:[%s8290_s1 + $0x508] sm:$0xff]  }
  0xc4   : > { %5452 = vmatpush3.bf16.msra.mxu1 %v5936_v0  ;;  %3007 = vmatprep.mubr.bf16.mxu1 %v8377_v5  ;;  %v5947_v0 = vld [vmem:[%s8290_s1 + $0x520] sm:$0xff]   ;;  %v7445_v5 = vld [vmem:[%s6293_s7 + $0x110] sm:$0x11] }
  0xc5   : > { %5414 = vmatpush3.bf16.msra.mxu0 %v5939_v7  ;;  %5453 = vmatprep.subr.bf16.mxu1 %v5938_v1  ;;  %v5946_v7 = vld [vmem:[%s8290_s1 + $0x5e0] sm:$0xff]   ;;  %v2653_v1 = vor.u32 %v2652_v13, %v2649_v6  ;;  %v5954_v6 = vld [vmem:[%s8290_s1 + $0x5d0] sm:$0xff]   ;;  %v5957_v13 = vld [vmem:[%s8290_s1 + $0x548] sm:$0xff]  }
  0xc6   : > { %5415 = vmatprep.subr.bf16.mxu0 %v5941_v57  ;;  %v5951_v57 = vld [vmem:[%s8290_s1 + $0x518] sm:$0xff]  }
  0xc7   : > { %v2654_v47 = vrot.slane %v2653_v1, 4  ;;  %v5960_v1 = vld [vmem:[%s8290_s1 + $0x588] sm:$0xff]  }
  0xc8   : > { %2943 = vmatmul.mubr.bf16.gmra.mxu0 %v8378_v39  ;;  %5454 = vmatpush3.bf16.msra.mxu1 %v5940_v34  ;;  %v5950_v34 = vld [vmem:[%s8290_s1 + $0x5d8] sm:$0xff]   ;;  %v5956_v39 = vld [vmem:[%s8290_s1 + $0x590] sm:$0xff]  }
  0xc9   : > { %5416 = vmatpush3.bf16.msra.mxu0 %v5943_v50  ;;  %5455 = vmatprep.subr.bf16.mxu1 %v5942_v2  ;;  %v8382_v2 = vcombine.low %v6588_v25, %v6704_v52  ;;  %v2668_v50 = vrot.slane %v2667_v30, 4  ;;  %v2656_v52 = vshll.u32 %v7445_v5, 16  ;;  %v5962_v30 = vld [vmem:[%s8290_s1 + $0x5c0] sm:$0xff]  }
  0xca   : > { %5417 = vmatprep.subr.bf16.mxu0 %v5945_v55  ;;  %2950 = vmatprep.mubr.bf16.mxu0 %v8379_v42  ;;  %v7448_v55 = vld [vmem:[%s6293_s7 + $0x118] sm:$0x11] }
  0xcb   : > { %3008 = vmatmul.mubr.bf16.gmra.mxu1 %v8380_v19  ;;  %v2670_v25 = vshll.u32 %v7448_v55, 16 }
  0xcc   : > { %5456 = vmatpush3.bf16.msra.mxu1 %v5944_v28  ;;  %3015 = vmatprep.mubr.bf16.mxu1 %v8381_v36  ;;  %v2658_v28 = vrot.slane %v2656_v52, 5  ;;  %v8384_v36 = vcombine.high %v6466_v40, %v6597_v29  ;;  %v5971_v52 = vld [vmem:[%s8290_s1 + $0x630] sm:$0xff]  }
  0xcd   : > { %5418 = vmatpush3.bf16.msra.mxu0 %v5947_v0  ;;  %5457 = vmatprep.subr.bf16.mxu1 %v5946_v7  ;;  %v2672_v4 = vrot.slane %v2670_v25, 5  ;;  %v5958_v0 = vld [vmem:[%s8290_s1 + $0x5c8] sm:$0xff]   ;;  %v5972_v25 = vld [vmem:[%s8290_s1 + $0x6b0] sm:$0xff]  }
  0xce   : > { %5419 = vmatprep.subr.bf16.mxu0 %v5949_v33  ;;  %v7469_v7 = vsel %vm6346_vm2, %v2654_v47, %v2658_v28  ;;  %v5967_v47 = vld [vmem:[%s8290_s1 + $0x638] sm:$0xff]   ;;  %v5974_v28 = vld [vmem:[%s8290_s1 + $0x6e8] sm:$0xff]  }
  0xcf   : > { %v7473_v54 = vsel %vm6346_vm2, %v2668_v50, %v2672_v4  ;;  %v4808_v33 = vcombine.low %v6712_v63, %v7469_v7  ;;  %v5970_v50 = vld [vmem:[%s8290_s1 + $0x6f0] sm:$0xff]   ;;  %v4844_v4 = vrot.slane %v7294_v41, 9  ;;  %v5979_v41 = vld [vmem:[%s8290_s1 + $0x620] sm:$0xff]  }
  0xd0   : > { %2951 = vmatmul.mubr.bf16.gmra.mxu0 %v8382_v2  ;;  %5458 = vmatpush3.bf16.msra.mxu1 %v5948_v48  ;;  %v4809_v48 = vcombine.high %v6712_v63, %v7469_v7  ;;  %v4811_v42 = vcombine.high %v6770_v15, %v7473_v54  ;;  %v4810_v19 = vcombine.low %v6770_v15, %v7473_v54  ;;  %v5963_v63 = vld [vmem:[%s8290_s1 + $0x500] sm:$0xff]   ;;  %v5968_v2 = vld [vmem:[%s8290_s1 + $0x6b8] sm:$0xff]  }
  0xd1   : > { %5420 = vmatpush3.bf16.msra.mxu0 %v5951_v57  ;;  %5459 = vmatprep.subr.bf16.mxu1 %v5950_v34  ;;  %v5961_v34 = vld [vmem:[%s8290_s1 + $0x540] sm:$0xff]   ;;  %v5965_v57 = vld [vmem:[%s8290_s1 + $0x678] sm:$0xff]  }
  0xd2   : > { %5421 = vmatprep.subr.bf16.mxu0 %v5953_v44  ;;  %2958 = vmatprep.mubr.bf16.mxu0 %v4809_v48  ;;  %v5964_v15 = vld [vmem:[%s8290_s1 + $0x580] sm:$0xff]   ;;  %v5966_v44 = vld [vmem:[%s8290_s1 + $0x6f8] sm:$0xff]  }
  0xd3   : > { %3016 = vmatmul.mubr.bf16.gmra.mxu1 %v8383_v53  ;;  %v8388_v53 = vcombine.low %v6532_v11, %v6727_v10  ;;  %v5978_v48 = vld [vmem:[%s8290_s1 + $0x6e0] sm:$0xff]  }
  0xd4   : > { %5460 = vmatpush3.bf16.msra.mxu1 %v5952_v17  ;;  %3023 = vmatprep.mubr.bf16.mxu1 %v4811_v42  ;;  %v8385_v17 = vcombine.high %v6532_v11, %v6727_v10  ;;  %v5975_v11 = vld [vmem:[%s8290_s1 + $0x628] sm:$0xff]   ;;  %v4845_v42 = vrot.slane %v7297_v9, 9 }
  0xd5   : > { %5422 = vmatpush3.bf16.msra.mxu0 %v5955_v22  ;;  %5461 = vmatprep.subr.bf16.mxu1 %v5954_v6  ;;  %v5969_v22 = vld [vmem:[%s8290_s1 + $0x670] sm:$0xff]   ;;  %v8386_v6 = vcombine.low %v6466_v40, %v6597_v29  ;;  %v5973_v40 = vld [vmem:[%s8290_s1 + $0x668] sm:$0xff]   ;;  %v8389_v29 = vld [vmem:[#allocation21_spill] sm:$0xff] }
  0xd6   : > { %5423 = vmatprep.subr.bf16.mxu0 %v5957_v13  ;;  %v8387_v13 = vcombine.high %v6723_v37, %v6824_v8  ;;  %v5976_v10 = vld [vmem:[%s8290_s1 + $0x6a8] sm:$0xff]  }
  0xd8   : > { %5462 = vmatpush3.bf16.msra.mxu1 %v5956_v39  ;;  %2959 = vmatmul.mubr.bf16.gmra.mxu0 %v4808_v33  ;;  %v8390_v39 = vcombine.high %v6800_v61, %v8389_v29  ;;  %v8391_v33 = vcombine.low %v6723_v37, %v6824_v8  ;;  %v8393_v37 = vcombine.low %v6800_v61, %v8389_v29  ;;  %v5981_v8 = vld [vmem:[%s8290_s1 + $0x658] sm:$0xff]  }
  0xd9   : > { %5463 = vmatprep.subr.bf16.mxu1 %v5958_v0  ;;  %5424 = vmatpush3.bf16.msra.mxu0 %v5959_v26  ;;  %v5977_v0 = vld [vmem:[%s8290_s1 + $0x660] sm:$0xff]   ;;  %v3044_v26 = vrot.slane %v7445_v5, 5  ;;  %v5983_v61 = vld [vmem:[%s8290_s1 + $0x618] sm:$0xff]  }
  0xda   : > { %5425 = vmatprep.subr.bf16.mxu0 %v5961_v34  ;;  %3310 = vmatprep.mubr.bf16.mxu0 %v8384_v36  ;;  %v5980_v5 = vld [vmem:[%s8290_s1 + $0x6a0] sm:$0xff]   ;;  %v5982_v34 = vld [vmem:[%s8290_s1 + $0x6d8] sm:$0xff]   ;;  %v5985_v36 = vld [vmem:[%s8290_s1 + $0x650] sm:$0xff]  }
  0xdb   : > { %3024 = vmatmul.mubr.bf16.gmra.mxu1 %v4810_v19  ;;  %v8392_v19 = vcombine.high %v6842_v14, %v6985_v31  ;;  %v7585_v9 = vsel %vm6442_vm5, %v4844_v4, %v3044_v26  ;;  %v5994_v4 = vld [vmem:[%s8290_s1 + $0x6c0] sm:$0xff]  }
  0xdc   : > { %5464 = vmatpush3.bf16.msra.mxu1 %v5960_v1  ;;  %3375 = vmatprep.mubr.bf16.mxu1 %v8385_v17  ;;  %v3048_v1 = vrot.slane %v7448_v55, 5  ;;  %v8394_v55 = vcombine.high %v6883_v32, %v6989_v56  ;;  %v5986_v17 = vld [vmem:[%s8290_s1 + $0x6d0] sm:$0xff]   ;;  %v4858_v29 = vcombine.low %v7126_v38, %v7585_v9  ;;  %v5995_v26 = vld [vmem:[%s8290_s1 + $0x600] sm:$0xff]  }
  0xdd   : > { %5465 = vmatprep.subr.bf16.mxu1 %v5962_v30  ;;  %5426 = vmatpush3.bf16.msra.mxu0 %v5963_v63 }
  0xde   : > { %5491 = vmatprep.subr.bf16.mxu0 %v5965_v57  ;;  %v7598_v30 = vsel %vm6442_vm5, %v4845_v42, %v3048_v1  ;;  %v4859_v57 = vcombine.high %v7126_v38, %v7585_v9  ;;  %v8397_v42 = vld [vmem:[#allocation20_spill] sm:$0xff]  ;;  %v8398_v1 = vld [vmem:[#allocation22_spill] sm:$0xff] }
  0xe0   : > { %5466 = vmatpush3.bf16.msra.mxu1 %v5964_v15  ;;  %3311 = vmatmul.mubr.bf16.vlgmr.msra.gmra.mxu0 %v8386_v6  ;;  %v5984_v15 = vld [vmem:[%s8290_s1 + $0x698] sm:$0xff]  }
  0xe1   : > { %5531 = vmatprep.subr.bf16.mxu1 %v5966_v44  ;;  %5492 = vmatpush3.bf16.msra.mxu0 %v5967_v47  ;;  %v4861_v47 = vcombine.high %v7141_v18, %v7598_v30 }
  0xe2   : > { %3318 = vmatprep.mubr.bf16.mxu0 %v8387_v13  ;;  %5493 = vmatprep.subr.bf16.mxu0 %v5969_v22  ;;  %v8395_v22 = vcombine.low %v6842_v14, %v6985_v31  ;;  %v5989_v14 = vld [vmem:[%s8290_s1 + $0x648] sm:$0xff]  }
  0xe3   : > { %3376 = vmatmul.mubr.bf16.vlgmr.msra.gmra.mxu1 %v8388_v53  ;;  %v5990_v53 = vld [vmem:[%s8290_s1 + $0x6c8] sm:$0xff]  }
  0xe4   : > { %5532 = vmatpush3.bf16.msra.mxu1 %v5968_v2  ;;  %3383 = vmatprep.mubr.bf16.mxu1 %v8390_v39  ;;  %v5992_v39 = vld [vmem:[%s8290_s1 + $0x688] sm:$0xff]  }
  0xe5   : > { %5533 = vmatprep.subr.bf16.mxu1 %v5970_v50  ;;  %5494 = vmatpush3.bf16.msra.mxu0 %v5971_v52  ;;  %v5987_v50 = vld [vmem:[%s8290_s1 + $0x610] sm:$0xff]  }
  0xe6   : > { %5495 = vmatprep.subr.bf16.mxu0 %v5973_v40  ;;  %v5988_v52 = vld [vmem:[%s8290_s1 + $0x690] sm:$0xff]  }
  0xe8   : > { %5534 = vmatpush3.bf16.msra.mxu1 %v5972_v25  ;;  %3319 = vmatmul.mubr.bf16.gmra.mxu0 %v8391_v33  ;;  %v8396_v25 = vcombine.low %v6883_v32, %v6989_v56  ;;  %v5991_v32 = vld [vmem:[%s8290_s1 + $0x608] sm:$0xff]  }
  0xe9   : > { %5535 = vmatprep.subr.bf16.mxu1 %v5974_v28  ;;  %5496 = vmatpush3.bf16.msra.mxu0 %v5975_v11  ;;  %v4860_v11 = vcombine.low %v7141_v18, %v7598_v30 }
  0xea   : > { %3326 = vmatprep.mubr.bf16.mxu0 %v8392_v19  ;;  %5497 = vmatprep.subr.bf16.mxu0 %v5977_v0 }
  0xeb   : > { %3384 = vmatmul.mubr.bf16.gmra.mxu1 %v8393_v37  ;;  %v5999_v37 = vld [vmem:[%s8290_s1 + $0x738] sm:$0xff]  }
  0xec   : > { %5536 = vmatpush3.bf16.msra.mxu1 %v5976_v10  ;;  %3391 = vmatprep.mubr.bf16.mxu1 %v8394_v55  ;;  %v5993_v10 = vld [vmem:[%s8290_s1 + $0x640] sm:$0xff]   ;;  %v6000_v55 = vld [vmem:[%s8290_s1 + $0x7b8] sm:$0xff]  }
  0xed   : > { %5537 = vmatprep.subr.bf16.mxu1 %v5978_v48  ;;  %5498 = vmatpush3.bf16.msra.mxu0 %v5979_v41  ;;  %v5996_v48 = vld [vmem:[%s8290_s1 + $0x680] sm:$0xff]   ;;  %v5997_v41 = vld [vmem:[%s8290_s1 + $0x778] sm:$0xff]  }
  0xee   : > { %5499 = vmatprep.subr.bf16.mxu0 %v5981_v8 }
  0xf0   : > { %5538 = vmatpush3.bf16.msra.mxu1 %v5980_v5  ;;  %3327 = vmatmul.mubr.bf16.gmra.mxu0 %v8395_v22  ;;  %v5998_v5 = vld [vmem:[%s8290_s1 + $0x7f8] sm:$0xff]   ;;  %v6004_v22 = vld [vmem:[%s8290_s1 + $0x7b0] sm:$0xff]  }
  0xf1   : > { %5539 = vmatprep.subr.bf16.mxu1 %v5982_v34  ;;  %5500 = vmatpush3.bf16.msra.mxu0 %v5983_v61  ;;  %v6001_v61 = vld [vmem:[%s8290_s1 + $0x770] sm:$0xff]  }
  0xf2   : > { %3334 = vmatprep.mubr.bf16.mxu0 %v4859_v57  ;;  %5501 = vmatprep.subr.bf16.mxu0 %v5985_v36 }
  0xf3   : > { %3392 = vmatmul.mubr.bf16.gmra.mxu1 %v8396_v25  ;;  %v6005_v25 = vld [vmem:[%s8290_s1 + $0x768] sm:$0xff]  }
  0xf4   : > { %5540 = vmatpush3.bf16.msra.mxu1 %v5984_v15  ;;  %3399 = vmatprep.mubr.bf16.mxu1 %v4861_v47  ;;  %v6002_v15 = vld [vmem:[%s8290_s1 + $0x7f0] sm:$0xff]  }
  0xf5   : > { %v5027_v63 = vpop.f32.mrf.mxu0  ;;  %5541 = vmatprep.subr.bf16.mxu1 %v5986_v17  ;;  %5502 = vmatpush3.bf16.msra.mxu0 %v5987_v50  ;;  %v6003_v17 = vld [vmem:[%s8290_s1 + $0x730] sm:$0xff]   ;;  %v8400_v50 = vld [vmem:[#allocation24_spill] sm:$0xff] }
  0xf6   : > { %5503 = vmatprep.subr.bf16.mxu0 %v5989_v14 }
  0xf7   : > { %v5028_v44 = vpop.f32.mrf.mxu0 }
  0xf8   : > { %v5029_v2 = vadd.f32 %v5028_v44, %v5027_v63  ;;  %5542 = vmatpush3.bf16.msra.mxu1 %v5988_v52  ;;  %3335 = vmatmul.mubr.bf16.gmra.mxu0 %v4858_v29  ;;  %v8399_v44 = vld [vmem:[#allocation23_spill] sm:$0xff]  ;;  %v8401_v52 = vld [vmem:[#allocation25_spill] sm:$0xff] }
  0xf9   : > { %v5030_v6 = vpop.f32.mrf.mxu0  ;;  %5543 = vmatprep.subr.bf16.mxu1 %v5990_v53  ;;  %5504 = vmatpush3.bf16.msra.mxu0 %v5991_v32  ;;  %v6006_v53 = vld [vmem:[%s8290_s1 + $0x7e8] sm:$0xff]  }
  0xfa   : > { %v5067_v31 = vpop.f32.mrf.mxu1  ;;  %3654 = vmatprep.mubr.bf16.mxu0 %v8397_v42  ;;  %5505 = vmatprep.subr.bf16.mxu0 %v5993_v10  ;;  %v6007_v32 = vld [vmem:[%s8290_s1 + $0x728] sm:$0xff]   ;;  %v6010_v10 = vld [vmem:[%s8290_s1 + $0x7e0] sm:$0xff]  }
  0xfb   : > { %v5031_v13 = vpop.f32.mrf.mxu0  ;;  %3400 = vmatmul.mubr.bf16.gmra.mxu1 %v4860_v11 }
  0xfc   : > { %v5032_v40 = vadd.f32 %v5031_v13, %v5030_v6  ;;  %v5068_v56 = vpop.f32.mrf.mxu1  ;;  %5544 = vmatpush3.bf16.msra.mxu1 %v5992_v39  ;;  %3719 = vmatprep.mubr.bf16.mxu1 %v8398_v1  ;;  %v8402_v13 = vld [vmem:[#allocation26_spill] sm:$0xff] }
  0xfd   : > { %v5069_v28 = vadd.f32 %v5068_v56, %v5067_v31  ;;  %5545 = vmatprep.subr.bf16.mxu1 %v5994_v4  ;;  %5506 = vmatpush3.bf16.msra.mxu0 %v5995_v26  ;;  %v6008_v39 = vld [vmem:[%s8290_s1 + $0x7a8] sm:$0xff]   ;;  %v6011_v4 = vld [vmem:[%s8290_s1 + $0x720] sm:$0xff]  }
  0xfe   : > { %v5070_v38 = vpop.f32.mrf.mxu1  ;;  %5571 = vmatprep.subr.bf16.mxu0 %v5997_v41 }
  0xff   : > { %v7647_v0 = vadd.f32 %v5069_v28, %v5029_v2  ;;  %v6009_v28 = vld [vmem:[%s8290_s1 + $0x760] sm:$0xff]  }
 0x100   : > { %v5071_v18 = vpop.f32.mrf.mxu1  ;;  %5546 = vmatpush3.bf16.msra.mxu1 %v5996_v48  ;;  %3655 = vmatmul.mubr.bf16.vlgmr.msra.gmra.mxu0 %v8399_v44  ;;  %v6013_v48 = vld [vmem:[%s8290_s1 + $0x758] sm:$0xff]  }
 0x101   : > { %v5072_v33 = vadd.f32 %v5071_v18, %v5070_v38  ;;  %v5033_v8 = vpop.f32.mrf.mxu0  ;;  %5611 = vmatprep.subr.bf16.mxu1 %v5998_v5  ;;  %5572 = vmatpush3.bf16.msra.mxu0 %v5999_v37  ;;  %v8403_v38 = vld [vmem:[#allocation27_spill] sm:$0xff]  ;;  %v6012_v18 = vld [vmem:[%s8290_s1 + $0x7a0] sm:$0xff]   ;;  %v6016_v5 = vld [vmem:[%s8290_s1 + $0x798] sm:$0xff]  }
 0x102   : > { %v5073_v34 = vpop.f32.mrf.mxu1  ;;  %3662 = vmatprep.mubr.bf16.mxu0 %v8400_v50  ;;  %5573 = vmatprep.subr.bf16.mxu0 %v6001_v61  ;;  %v6019_v61 = vld [vmem:[%s8290_s1 + $0x710] sm:$0xff]  }
 0x103   : > { %v7663_v19 = vadd.f32 %v5072_v33, %v5032_v40  ;;  %v5034_v63 = vpop.f32.mrf.mxu0  ;;  %3720 = vmatmul.mubr.bf16.vlgmr.msra.gmra.mxu1 %v8401_v52  ;;  %v6014_v33 = vld [vmem:[%s8290_s1 + $0x7d8] sm:$0xff]   ;;  %v6021_v52 = vld [vmem:[%s8290_s1 + $0x748] sm:$0xff]  }
 0x104   : > { %v5035_v57 = vadd.f32 %v5034_v63, %v5033_v8  ;;  %v5074_v36 = vpop.f32.mrf.mxu1  ;;  %5612 = vmatpush3.bf16.msra.mxu1 %v6000_v55  ;;  %3727 = vmatprep.mubr.bf16.mxu1 %v8402_v13  ;;  %v6018_v8 = vld [vmem:[%s8290_s1 + $0x7d0] sm:$0xff]  }
 0x105   : > { %v5075_v47 = vadd.f32 %v5074_v36, %v5073_v34  ;;  %v5036_v2 = vpop.f32.mrf.mxu0  ;;  %5613 = vmatprep.subr.bf16.mxu1 %v6002_v15  ;;  %5574 = vmatpush3.bf16.msra.mxu0 %v6003_v17  ;;  %v7741_v15 = vld [vmem:[%s6293_s7 + $0x120] sm:$0xff]  ;;  %v7747_v17 = vld [vmem:[%s6293_s7 + $0x128] sm:$0xff] }
 0x106   : > { %v5076_v6 = vpop.f32.mrf.mxu1  ;;  %5575 = vmatprep.subr.bf16.mxu0 %v6005_v25  ;;  %v6063_v36 = vld [vmem:[%s6293_s7 + $0x100] sm:$0xff] }
 0x107   : > { %v7689_v14 = vadd.f32 %v5075_v47, %v5035_v57  ;;  %v5037_v31 = vpop.f32.mrf.mxu0  ;;  %v4895_v44 = vcombine.high %v6063_v36, %v7741_v15  ;;  %v4894_v13 = vcombine.low %v6063_v36, %v7741_v15 }
 0x108   : > { %v5038_v40 = vadd.f32 %v5037_v31, %v5036_v2  ;;  %v5077_v29 = vpop.f32.mrf.mxu1  ;;  %5614 = vmatpush3.bf16.msra.mxu1 %v6004_v22  ;;  %3663 = vmatmul.mubr.bf16.gmra.mxu0 %v8403_v38  ;;  %v6020_v2 = vld [vmem:[%s8290_s1 + $0x790] sm:$0xff]   ;;  %v6064_v22 = vld [vmem:[%s6293_s7 + $0x108] sm:$0xff]  ;;  %v6027_v38 = vld [vmem:[%s8290_s1 + $0x700] sm:$0xff]  }
 0x109   : > { %v5078_v56 = vadd.f32 %v5077_v29, %v5076_v6  ;;  %5615 = vmatprep.subr.bf16.mxu1 %v6006_v53  ;;  %5576 = vmatpush3.bf16.msra.mxu0 %v6007_v32  ;;  %v4897_v50 = vcombine.high %v6064_v22, %v7747_v17  ;;  %v8404_v6 = vld [vmem:[#allocation28_spill] sm:$0xff]  ;;  %v6022_v31 = vld [vmem:[%s8290_s1 + $0x7c8] sm:$0xff]  }
 0x10a   : > { %3670 = vmatprep.mubr.bf16.mxu0 %v6973_v24  ;;  %5577 = vmatprep.subr.bf16.mxu0 %v6009_v28  ;;  %v6015_v24 = vld [vmem:[%s8290_s1 + $0x718] sm:$0xff]   ;;  %v6023_v53 = vld [vmem:[%s8290_s1 + $0x708] sm:$0xff]   ;;  %v6026_v28 = vld [vmem:[%s8290_s1 + $0x7c0] sm:$0xff]  }
 0x10b   : > { %v7704_v11 = vadd.f32 %v5078_v56, %v5038_v40  ;;  %v5039_v26 = vpop.f32.mrf.mxu0  ;;  %3728 = vmatmul.mubr.bf16.gmra.mxu1 %v6978_v51  ;;  %v6024_v29 = vld [vmem:[%s8290_s1 + $0x788] sm:$0xff]   ;;  %v4896_v56 = vcombine.low %v6064_v22, %v7747_v17  ;;  %v6035_v22 = vld [vmem:[%s8290_s1 + $0x830] sm:$0xff]  }
 0x10c   : > { %5616 = vmatpush3.bf16.msra.mxu1 %v6008_v39  ;;  %3735 = vmatprep.mubr.bf16.mxu1 %v7005_v21  ;;  %v6017_v21 = vld [vmem:[%s8290_s1 + $0x750] sm:$0xff]   ;;  %v6025_v39 = vld [vmem:[%s8290_s1 + $0x740] sm:$0xff]  }
 0x10d   : > { %v5040_v42 = vpop.f32.mrf.mxu0  ;;  %5617 = vmatprep.subr.bf16.mxu1 %v6010_v10  ;;  %5578 = vmatpush3.bf16.msra.mxu0 %v6011_v4 }
 0x10e   : > { %v5041_v41 = vadd.f32 %v5040_v42, %v5039_v26  ;;  %5579 = vmatprep.subr.bf16.mxu0 %v6013_v48  ;;  %v6028_v26 = vld [vmem:[%s8290_s1 + $0x780] sm:$0xff]  }
 0x10f   : > { %v5042_v51 = vpop.f32.mrf.mxu0 }
 0x110   : > { %v5079_v1 = vpop.f32.mrf.mxu1  ;;  %5618 = vmatpush3.bf16.msra.mxu1 %v6012_v18  ;;  %3671 = vmatmul.mubr.bf16.gmra.mxu0 %v7019_v12  ;;  %v8405_v18 = vld [vmem:[#allocation8_spill] sm:$0xff] }
 0x111   : > { %v5043_v55 = vpop.f32.mrf.mxu0  ;;  %5619 = vmatprep.subr.bf16.mxu1 %v6014_v33  ;;  %5580 = vmatpush3.bf16.msra.mxu0 %v6015_v24  ;;  %v6029_v33 = vld [vmem:[%s8290_s1 + $0x878] sm:$0xff]  }
 0x112   : > { %v5080_v37 = vpop.f32.mrf.mxu1  ;;  %v5044_v63 = vadd.f32 %v5043_v55, %v5042_v51  ;;  %5581 = vmatprep.subr.bf16.mxu0 %v6017_v21  ;;  %3678 = vmatprep.mubr.bf16.mxu0 %v4895_v44  ;;  %v8407_v44 = vld [vmem:[#allocation9_spill] sm:$0xff] }
 0x113   : > { %v5081_v34 = vadd.f32 %v5080_v37, %v5079_v1  ;;  %3736 = vmatmul.mubr.bf16.gmra.mxu1 %v8404_v6  ;;  %v6030_v1 = vld [vmem:[%s8290_s1 + $0x8f8] sm:$0xff]  }
 0x114   : > { %v5082_v57 = vpop.f32.mrf.mxu1  ;;  %5620 = vmatpush3.bf16.msra.mxu1 %v6016_v5  ;;  %3743 = vmatprep.mubr.bf16.mxu1 %v4897_v50  ;;  %v6031_v5 = vld [vmem:[%s8290_s1 + $0x838] sm:$0xff]  }
 0x115   : > { %v7749_v47 = vadd.f32 %v5081_v34, %v5041_v41  ;;  %5621 = vmatprep.subr.bf16.mxu1 %v6018_v8  ;;  %5582 = vmatpush3.bf16.msra.mxu0 %v6019_v61  ;;  %v8406_v41 = vld [vmem:[#allocation10_spill] sm:$0xff]  ;;  %v6032_v8 = vld [vmem:[%s8290_s1 + $0x8b8] sm:$0xff]   ;;  %v6033_v61 = vld [vmem:[%s8290_s1 + $0x870] sm:$0xff]  }
 0x116   : > { %v5083_v12 = vpop.f32.mrf.mxu1  ;;  %5583 = vmatprep.subr.bf16.mxu0 %v6021_v52  ;;  %v8408_v52 = vld [vmem:[#allocation12_spill] sm:$0xff] }
 0x117   : > { %v5084_v25 = vadd.f32 %v5083_v12, %v5082_v57  ;;  %v6034_v57 = vld [vmem:[%s8290_s1 + $0x8f0] sm:$0xff]  }
 0x118   : > { %v5045_v32 = vpop.f32.mrf.mxu0  ;;  %5622 = vmatpush3.bf16.msra.mxu1 %v6020_v2  ;;  %3679 = vmatmul.mubr.bf16.gmra.mxu0 %v4894_v13  ;;  %v6036_v12 = vld [vmem:[%s8290_s1 + $0x8b0] sm:$0xff]  }
 0x119   : > { %v7767_v40 = vadd.f32 %v5084_v25, %v5044_v63  ;;  %5623 = vmatprep.subr.bf16.mxu1 %v6022_v31  ;;  %5584 = vmatpush3.bf16.msra.mxu0 %v6023_v53  ;;  %v3761_v25 = vshrl.u32 %v7741_v15, 16  ;;  %v8409_v13 = vld [vmem:[#allocation11_spill] sm:$0xff] }
 0x11a   : > { %v5046_v10 = vpop.f32.mrf.mxu0  ;;  %4024 = vmatprep.mubr.bf16.mxu0 %v8405_v18  ;;  %5585 = vmatprep.subr.bf16.mxu0 %v6025_v39  ;;  %v6039_v18 = vld [vmem:[%s8290_s1 + $0x828] sm:$0xff]  }
 0x11b   : > { %v5047_v4 = vadd.f32 %v5046_v10, %v5045_v32  ;;  %v5085_v48 = vpop.f32.mrf.mxu1  ;;  %3744 = vmatmul.mubr.bf16.gmra.mxu1 %v4896_v56  ;;  %v3764_v32 = vshll.u32 %v7741_v15, 16  ;;  %v6038_v10 = vld [vmem:[%s8290_s1 + $0x8e8] sm:$0xff]  }
 0x11c   : > { %v5048_v42 = vpop.f32.mrf.mxu0  ;;  %5624 = vmatpush3.bf16.msra.mxu1 %v6024_v29  ;;  %4089 = vmatprep.mubr.bf16.mxu1 %v8406_v41  ;;  %v6037_v29 = vld [vmem:[%s8290_s1 + $0x868] sm:$0xff]   ;;  %v3763_v41 = vrot.slane %v3761_v25, 4  ;;  %v6045_v25 = vld [vmem:[%s8290_s1 + $0x858] sm:$0xff]  }
 0x11d   : > { %v5086_v24 = vpop.f32.mrf.mxu1  ;;  %5625 = vmatprep.subr.bf16.mxu1 %v6026_v28  ;;  %5586 = vmatpush3.bf16.msra.mxu0 %v6027_v38  ;;  %v8410_v28 = vld [vmem:[#allocation14_spill] sm:$0xff]  ;;  %v3775_v38 = vshrl.u32 %v7747_v17, 16 }
 0x11e   : > { %v5049_v51 = vpop.f32.mrf.mxu0  ;;  %v5087_v21 = vadd.f32 %v5086_v24, %v5085_v48  ;;  %5651 = vmatprep.subr.bf16.mxu0 %v6029_v33  ;;  %v3778_v48 = vshll.u32 %v7747_v17, 16  ;;  %v6040_v33 = vld [vmem:[%s8290_s1 + $0x8a8] sm:$0xff]  }
 0x11f   : > { %v5050_v37 = vadd.f32 %v5049_v51, %v5048_v42  ;;  %v5088_v55 = vpop.f32.mrf.mxu1  ;;  %v6041_v51 = vld [vmem:[%s8290_s1 + $0x860] sm:$0xff]  }
 0x120   : > { %v5107_v34 = vpop.f32.mrf.mxu0  ;;  %v7802_v63 = vadd.f32 %v5087_v21, %v5047_v4  ;;  %5626 = vmatpush3.bf16.msra.mxu1 %v6028_v26  ;;  %4025 = vmatmul.mubr.bf16.vlgmr.msra.gmra.mxu0 %v8407_v44  ;;  %v3780_v44 = vrot.slane %v3778_v48, 5 }
 0x121   : > { %v5089_v36 = vpop.f32.mrf.mxu1  ;;  %5691 = vmatprep.subr.bf16.mxu1 %v6030_v1  ;;  %5652 = vmatpush3.bf16.msra.mxu0 %v6031_v5  ;;  %v3766_v5 = vrot.slane %v3764_v32, 5 }
 0x122   : > { %v5108_v2 = vpop.f32.mrf.mxu0  ;;  %v5090_v50 = vadd.f32 %v5089_v36, %v5088_v55  ;;  %4032 = vmatprep.mubr.bf16.mxu0 %v8408_v52  ;;  %5653 = vmatprep.subr.bf16.mxu0 %v6033_v61  ;;  %v3777_v55 = vrot.slane %v3775_v38, 4  ;;  %v8411_v61 = vld [vmem:[#allocation13_spill] sm:$0xff] }
 0x123   : > { %v5109_v6 = vadd.f32 %v5108_v2, %v5107_v34  ;;  %v5147_v31 = vpop.f32.mrf.mxu1  ;;  %4090 = vmatmul.mubr.bf16.vlgmr.msra.gmra.mxu1 %v8409_v13  ;;  %v6043_v36 = vld [vmem:[%s8290_s1 + $0x820] sm:$0xff]   ;;  %v3767_v32 = vor.u32 %v3766_v5, %v3763_v41  ;;  %v6050_v41 = vld [vmem:[%s8290_s1 + $0x8d0] sm:$0xff]  }
 0x124   : > { %v5110_v53 = vpop.f32.mrf.mxu0  ;;  %v7821_v56 = vadd.f32 %v5090_v50, %v5050_v37  ;;  %5692 = vmatpush3.bf16.msra.mxu1 %v6032_v8  ;;  %4097 = vmatprep.mubr.bf16.mxu1 %v8410_v28  ;;  %v6042_v8 = vld [vmem:[%s8290_s1 + $0x8e0] sm:$0xff]   ;;  %v8412_v50 = vld [vmem:[#allocation16_spill] sm:$0xff]  ;;  %v3781_v38 = vor.u32 %v3780_v44, %v3777_v55 }
 0x125   : > { %v1706_v39 = vadd.f32 %v5109_v6, %v7647_v0  ;;  %v5148_v4 = vpop.f32.mrf.mxu1  ;;  %5693 = vmatprep.subr.bf16.mxu1 %v6034_v57  ;;  %5654 = vmatpush3.bf16.msra.mxu0 %v6035_v22  ;;  %v7887_v55 = vld [vmem:[%s6293_s7 + $0x138] sm:$0x11] }
 0x126   : > { %v5111_v26 = vpop.f32.mrf.mxu0  ;;  %v5149_v42 = vadd.f32 %v5148_v4, %v5147_v31  ;;  %5655 = vmatprep.subr.bf16.mxu0 %v6037_v29  ;;  %v6046_v29 = vld [vmem:[%s8290_s1 + $0x8d8] sm:$0xff]  }
 0x127   : > { %v5112_v0 = vadd.f32 %v5111_v26, %v5110_v53  ;;  %v5150_v1 = vpop.f32.mrf.mxu1  ;;  %v8414_v53 = vld [vmem:[#allocation18_spill] sm:$0xff] }
 0x128   : > { %v5113_v24 = vpop.f32.mrf.mxu0  ;;  %v7839_v21 = vadd.f32 %v5149_v42, %v1706_v39  ;;  %5694 = vmatpush3.bf16.msra.mxu1 %v6036_v12  ;;  %4033 = vmatmul.mubr.bf16.gmra.mxu0 %v8411_v61  ;;  %v8413_v12 = vld [vmem:[#allocation15_spill] sm:$0xff] }
 0x129   : > { %v1709_v37 = vadd.f32 %v5112_v0, %v7663_v19  ;;  %v5151_v34 = vpop.f32.mrf.mxu1  ;;  %5695 = vmatprep.subr.bf16.mxu1 %v6038_v10  ;;  %5656 = vmatpush3.bf16.msra.mxu0 %v6039_v18  ;;  %v6044_v19 = vld [vmem:[%s8290_s1 + $0x8a0] sm:$0xff]   ;;  %v6047_v10 = vld [vmem:[%s8290_s1 + $0x818] sm:$0xff]   ;;  %v6049_v42 = vld [vmem:[%s8290_s1 + $0x850] sm:$0xff]  }
 0x12a   : > { %v5114_v57 = vpop.f32.mrf.mxu0  ;;  %v5152_v2 = vadd.f32 %v5151_v34, %v5150_v1  ;;  %4040 = vmatprep.mubr.bf16.mxu0 %v8412_v50  ;;  %5657 = vmatprep.subr.bf16.mxu0 %v6041_v51  ;;  %v3768_v1 = vrot.slane %v3767_v32, 4  ;;  %v8415_v51 = vld [vmem:[#allocation17_spill] sm:$0xff]  ;;  %v3782_v34 = vrot.slane %v3781_v38, 4 }
 0x12b   : > { %v5115_v22 = vadd.f32 %v5114_v57, %v5113_v24  ;;  %v5153_v6 = vpop.f32.mrf.mxu1  ;;  %4098 = vmatmul.mubr.bf16.gmra.mxu1 %v8413_v12  ;;  %v6052_v12 = vld [vmem:[%s8290_s1 + $0x890] sm:$0xff]  }
 0x12c   : > { %v5116_v52 = vpop.f32.mrf.mxu0  ;;  %v7857_v31 = vadd.f32 %v5152_v2, %v1709_v37  ;;  %5696 = vmatpush3.bf16.msra.mxu1 %v6040_v33  ;;  %4105 = vmatprep.mubr.bf16.mxu1 %v8414_v53  ;;  %v6051_v37 = vld [vmem:[%s8290_s1 + $0x810] sm:$0xff]  }
 0x12d   : > { %v1714_v13 = vadd.f32 %v5115_v22, %v7689_v14  ;;  %v5154_v39 = vpop.f32.mrf.mxu1  ;;  %5697 = vmatprep.subr.bf16.mxu1 %v6042_v8  ;;  %5658 = vmatpush3.bf16.msra.mxu0 %v6043_v36  ;;  %v6048_v14 = vld [vmem:[%s8290_s1 + $0x898] sm:$0xff]   ;;  %v7884_v8 = vld [vmem:[%s6293_s7 + $0x130] sm:$0x11]  ;;  %v3784_v36 = vshll.u32 %v7887_v55, 16 }
 0x12e   : > { %v5117_v28 = vpop.f32.mrf.mxu0  ;;  %v5155_v4 = vadd.f32 %v5154_v39, %v5153_v6  ;;  %5659 = vmatprep.subr.bf16.mxu0 %v6045_v25  ;;  %v3770_v57 = vshll.u32 %v7884_v8, 16  ;;  %v8416_v2 = vld [vmem:[#allocation19_spill] sm:$0xff] }
 0x12f   : > { %v5118_v26 = vadd.f32 %v5117_v28, %v5116_v52  ;;  %v5156_v18 = vpop.f32.mrf.mxu1  ;;  %v3786_v25 = vrot.slane %v3784_v36, 5 }
 0x130   : > { %v5119_v48 = vpop.f32.mrf.mxu0  ;;  %v7873_v0 = vadd.f32 %v5155_v4, %v1714_v13  ;;  %5698 = vmatpush3.bf16.msra.mxu1 %v6044_v19  ;;  %4041 = vmatmul.mubr.bf16.gmra.mxu0 %v8415_v51  ;;  %v6053_v19 = vld [vmem:[%s8290_s1 + $0x848] sm:$0xff]   ;;  %v3772_v52 = vrot.slane %v3770_v57, 5 }
 0x131   : > { %v1717_v33 = vadd.f32 %v5118_v26, %v7704_v11  ;;  %v5157_v24 = vpop.f32.mrf.mxu1  ;;  %5699 = vmatprep.subr.bf16.mxu1 %v6046_v29  ;;  %5660 = vmatpush3.bf16.msra.mxu0 %v6047_v10  ;;  %v6054_v13 = vld [vmem:[%s8290_s1 + $0x8c8] sm:$0xff]  }
 0x132   : > { %v5120_v5 = vpop.f32.mrf.mxu0  ;;  %v5158_v11 = vadd.f32 %v5157_v24, %v5156_v18  ;;  %5661 = vmatprep.subr.bf16.mxu0 %v6049_v42  ;;  %v3773_v28 = vsel %vm6346_vm2, %v3768_v1, %v3772_v52  ;;  %v6055_v10 = vld [vmem:[%s8290_s1 + $0x808] sm:$0xff]  }
 0x133   : > { %v5121_v61 = vadd.f32 %v5120_v5, %v5119_v48  ;;  %v5159_v44 = vpop.f32.mrf.mxu1  ;;  %4106 = vmatmul.mubr.bf16.gmra.mxu1 %v8416_v2  ;;  %v4930_v4 = vcombine.low %v7469_v7, %v3773_v28  ;;  %v4931_v26 = vcombine.high %v7469_v7, %v3773_v28 }
 0x134   : > { %v5122_v22 = vpop.f32.mrf.mxu0  ;;  %v7895_v50 = vadd.f32 %v5158_v11, %v1717_v33  ;;  %5700 = vmatpush3.bf16.msra.mxu1 %v6048_v14 }
 0x135   : > { %v1722_v6 = vadd.f32 %v5121_v61, %v7749_v47  ;;  %v5160_v53 = vpop.f32.mrf.mxu1  ;;  %5701 = vmatprep.subr.bf16.mxu1 %v6050_v41  ;;  %5662 = vmatpush3.bf16.msra.mxu0 %v6051_v37  ;;  %v3787_v47 = vsel %vm6346_vm2, %v3782_v34, %v3786_v25  ;;  %v6057_v41 = vld [vmem:[%s8290_s1 + $0x840] sm:$0xff]  }
 0x136   : > { %v5123_v29 = vpop.f32.mrf.mxu0  ;;  %v5161_v32 = vadd.f32 %v5160_v53, %v5159_v44  ;;  %v4932_v14 = vcombine.low %v7473_v54, %v3787_v47  ;;  %v4933_v18 = vcombine.high %v7473_v54, %v3787_v47  ;;  %5663 = vmatprep.subr.bf16.mxu0 %v6053_v19  ;;  %4048 = vmatprep.mubr.bf16.mxu0 %v4931_v26  ;;  %v6058_v54 = vld [vmem:[%s8290_s1 + $0x8c0] sm:$0xff]   ;;  %v4967_v26 = vrot.slane %v7747_v17, 9 }
 0x137   : > { %v5124_v39 = vadd.f32 %v5123_v29, %v5122_v22  ;;  %v5162_v38 = vpop.f32.mrf.mxu1  ;;  %v6059_v37 = vld [vmem:[%s8290_s1 + $0x800] sm:$0xff]  }
 0x138   : > { %v5125_v48 = vpop.f32.mrf.mxu0  ;;  %v7918_v42 = vadd.f32 %v5161_v32, %v1722_v6  ;;  %5702 = vmatpush3.bf16.msra.mxu1 %v6052_v12  ;;  %4113 = vmatprep.mubr.bf16.mxu1 %v4933_v18  ;;  %v6060_v61 = vld [vmem:[%s8290_s1 + $0x880] sm:$0xff]  }
 0x139   : > { %v1725_v33 = vadd.f32 %v5124_v39, %v7767_v40  ;;  %v5163_v7 = vpop.f32.mrf.mxu1  ;;  %4049 = vmatmul.mubr.bf16.gmra.mxu0 %v4930_v4  ;;  %5703 = vmatprep.subr.bf16.mxu1 %v6054_v13 }
 0x13a   : > { %v5126_v1 = vpop.f32.mrf.mxu0  ;;  %v5164_v24 = vadd.f32 %v5163_v7, %v5162_v38  ;;  %5664 = vmatpush3.bf16.msra.mxu0 %v6055_v10  ;;  %4376 = vmatprep.mubr.bf16.mxu0 %v6742_v46  ;;  %v4134_v38 = vrot.slane %v7884_v8, 5 }
 0x13b   : > { %v5127_v51 = vadd.f32 %v5126_v1, %v5125_v48  ;;  %v5165_v5 = vpop.f32.mrf.mxu1  ;;  %4114 = vmatmul.mubr.bf16.gmra.mxu1 %v4932_v14  ;;  %5665 = vmatprep.subr.bf16.mxu0 %v6057_v41 }
 0x13c   : > { %v5128_v40 = vpop.f32.mrf.mxu0  ;;  %v7930_v34 = vadd.f32 %v5164_v24, %v1725_v33  ;;  %5704 = vmatpush3.bf16.msra.mxu1 %v6056_v62  ;;  %4441 = vmatprep.mubr.bf16.mxu1 %v6810_v16 }
 0x13d   : > { %v1730_v11 = vadd.f32 %v5127_v51, %v7802_v63  ;;  %v5166_v57 = vpop.f32.mrf.mxu1  ;;  %5705 = vmatprep.subr.bf16.mxu1 %v6058_v54 }
 0x13e   : > { %v5129_v36 = vpop.f32.mrf.mxu0  ;;  %v5167_v44 = vadd.f32 %v5166_v57, %v5165_v5  ;;  %5666 = vmatpush3.bf16.msra.mxu0 %v6059_v37 }
 0x13f   : > { %v5130_v2 = vadd.f32 %v5129_v36, %v5128_v40  ;;  %v5168_v22 = vpop.f32.mrf.mxu1 }
 0x140   : > { %v5187_v19 = vpop.f32.mrf.mxu0  ;;  %v7938_v6 = vadd.f32 %v5167_v44, %v1730_v11  ;;  %5706 = vmatpush3.bf16.msra.mxu1 %v6060_v61 }
 0x141   : > { %v1733_v63 = vadd.f32 %v5130_v2, %v7821_v56  ;;  %v5169_v12 = vpop.f32.mrf.mxu1  ;;  %4377 = vmatmul.mubr.bf16.vlgmr.msra.gmra.mxu0 %v6749_v23  ;;  %v4966_v23 = vrot.slane %v7741_v15, 9 }
 0x142   : > { %v5188_v52 = vpop.f32.mrf.mxu0  ;;  %v5170_v25 = vadd.f32 %v5169_v12, %v5168_v22  ;;  %4384 = vmatprep.mubr.bf16.mxu0 %v6847_v45  ;;  %v4138_v45 = vrot.slane %v7887_v55, 5 }
 0x143   : > { %v5189_v13 = vadd.f32 %v5188_v52, %v5187_v19  ;;  %v5227_v53 = vpop.f32.mrf.mxu1  ;;  %4442 = vmatmul.mubr.bf16.vlgmr.msra.gmra.mxu1 %v6814_v35  ;;  %v4135_v17 = vsel %vm6442_vm5, %v4966_v23, %v4134_v38 }
 0x144   : > { %v5190_v46 = vpop.f32.mrf.mxu0  ;;  %v7944_v16 = vadd.f32 %v5170_v25, %v1733_v63  ;;  %4449 = vmatprep.mubr.bf16.mxu1 %v6895_v58 }
 0x145   : > { %v5228_v29 = vpop.f32.mrf.mxu1 }
 0x146   : > { %v5191_v32 = vpop.f32.mrf.mxu0  ;;  %v5229_v39 = vadd.f32 %v5228_v29, %v5227_v53 }
 0x147   : > { %v5192_v56 = vadd.f32 %v5191_v32, %v5190_v46  ;;  %v5230_v28 = vpop.f32.mrf.mxu1 }
 0x148   : > { %v5193_v47 = vpop.f32.mrf.mxu0  ;;  %v2240_v10 = vadd.f32 %v5229_v39, %v5189_v13 }
 0x149   : > { %v5231_v4 = vpop.f32.mrf.mxu1  ;;  %4385 = vmatmul.mubr.bf16.gmra.mxu0 %v6852_v59 }
 0x14a   : > { %v5194_v35 = vpop.f32.mrf.mxu0  ;;  %v7952_v14 = vadd.f32 %v2240_v10, %v7839_v21  ;;  %v5232_v58 = vadd.f32 %v5231_v4, %v5230_v28  ;;  %4392 = vmatprep.mubr.bf16.mxu0 %v7137_v3  ;;  %v4139_v21 = vsel %vm6442_vm5, %v4967_v26, %v4138_v45  ;;  %v4969_v3 = vcombine.high %v7585_v9, %v4135_v17 }
 0x14b   : > { %v5195_v18 = vadd.f32 %v5194_v35, %v5193_v47  ;;  %v5233_v48 = vpop.f32.mrf.mxu1  ;;  %4450 = vmatmul.mubr.bf16.gmra.mxu1 %v6899_v49 }
 0x14c   : > { %v5196_v62 = vpop.f32.mrf.mxu0  ;;  %v2243_v15 = vadd.f32 %v5232_v58, %v5192_v56  ;;  %4457 = vmatprep.mubr.bf16.mxu1 %v7155_v43  ;;  %v4971_v43 = vcombine.high %v7598_v30, %v4139_v21 }
 0x14d   : > { %v5234_v8 = vpop.f32.mrf.mxu1 }
 0x14e   : > { %v5197_v55 = vpop.f32.mrf.mxu0  ;;  %v7963_v59 = vadd.f32 %v2243_v15, %v7857_v31  ;;  %v5235_v33 = vadd.f32 %v5234_v8, %v5233_v48 }
 0x14f   : > { %v5198_v41 = vadd.f32 %v5197_v55, %v5196_v62  ;;  %v5236_v49 = vpop.f32.mrf.mxu1 }
 0x150   : > { %v5199_v7 = vpop.f32.mrf.mxu0  ;;  %v2248_v1 = vadd.f32 %v5235_v33, %v5195_v18 }
 0x151   : > { %v5237_v54 = vpop.f32.mrf.mxu1  ;;  %4393 = vmatmul.mubr.bf16.gmra.mxu0 %v7167_v27  ;;  %v4970_v27 = vcombine.low %v7598_v30, %v4139_v21 }
 0x152   : > { %v5200_v24 = vpop.f32.mrf.mxu0  ;;  %v7968_v51 = vadd.f32 %v2248_v1, %v7873_v0  ;;  %v5238_v5 = vadd.f32 %v5237_v54, %v5236_v49  ;;  %4400 = vmatprep.mubr.bf16.mxu0 %v4969_v3  ;;  %v4968_v0 = vcombine.low %v7585_v9, %v4135_v17 }
 0x153   : > { %v5201_v20 = vadd.f32 %v5200_v24, %v5199_v7  ;;  %v5239_v31 = vpop.f32.mrf.mxu1  ;;  %4458 = vmatmul.mubr.bf16.gmra.mxu1 %v7182_v60 }
 0x154   : > { %v5202_v40 = vpop.f32.mrf.mxu0  ;;  %v2251_v37 = vadd.f32 %v5238_v5, %v5198_v41  ;;  %4465 = vmatprep.mubr.bf16.mxu1 %v4971_v43 }
 0x155   : > { %v5240_v11 = vpop.f32.mrf.mxu1 }
 0x156   : > { %v5203_v61 = vpop.f32.mrf.mxu0  ;;  %v7973_v57 = vadd.f32 %v2251_v37, %v7895_v50  ;;  %v5241_v36 = vadd.f32 %v5240_v11, %v5239_v31 }
 0x157   : > { %v5204_v44 = vadd.f32 %v5203_v61, %v5202_v40  ;;  %v5242_v2 = vpop.f32.mrf.mxu1 }
 0x158   : > { %v5205_v22 = vpop.f32.mrf.mxu0  ;;  %v2256_v19 = vadd.f32 %v5241_v36, %v5201_v20 }
 0x159   : > { %v5243_v63 = vpop.f32.mrf.mxu1  ;;  %4401 = vmatmul.mubr.bf16.gmra.mxu0 %v4968_v0 }
 0x15a   : > { %v5206_v60 = vpop.f32.mrf.mxu0  ;;  %v7978_v12 = vadd.f32 %v2256_v19, %v7918_v42  ;;  %v5244_v52 = vadd.f32 %v5243_v63, %v5242_v2 }
 0x15b   : > { %v5207_v25 = vadd.f32 %v5206_v60, %v5205_v22  ;;  %v5245_v13 = vpop.f32.mrf.mxu1  ;;  %4466 = vmatmul.mubr.bf16.gmra.mxu1 %v4970_v27 }
 0x15c   : > { %v5208_v50 = vpop.f32.mrf.mxu0  ;;  %v2259_v53 = vadd.f32 %v5244_v52, %v5204_v44 }
 0x15d   : > { %v5246_v46 = vpop.f32.mrf.mxu1 }
 0x15e   : > { %v5209_v29 = vpop.f32.mrf.mxu0  ;;  %v7981_v9 = vadd.f32 %v2259_v53, %v7930_v34  ;;  %v5247_v30 = vadd.f32 %v5246_v46, %v5245_v13 }
 0x15f   : > { %v5210_v32 = vadd.f32 %v5209_v29, %v5208_v50  ;;  %v5248_v39 = vpop.f32.mrf.mxu1 }
 0x160   : > { %v5267_v56 = vpop.f32.mrf.mxu0  ;;  %v2264_v28 = vadd.f32 %v5247_v30, %v5207_v25 }
 0x161   : > { %v5249_v47 = vpop.f32.mrf.mxu1 }
 0x162   : > { %v5268_v42 = vpop.f32.mrf.mxu0  ;;  %v7984_v10 = vadd.f32 %v2264_v28, %v7938_v6  ;;  %v5250_v23 = vadd.f32 %v5249_v47, %v5248_v39 }
 0x163   : > { %v5269_v38 = vadd.f32 %v5268_v42, %v5267_v56  ;;  %v5307_v4 = vpop.f32.mrf.mxu1 }
 0x164   : > { %v5270_v35 = vpop.f32.mrf.mxu0  ;;  %v2267_v26 = vadd.f32 %v5250_v23, %v5210_v32 }
 0x165   : > { %v5308_v45 = vpop.f32.mrf.mxu1 }
 0x166   : > { %v5271_v58 = vpop.f32.mrf.mxu0  ;;  %v7987_v34 = vadd.f32 %v2267_v26, %v7944_v16  ;;  %v5309_v18 = vadd.f32 %v5308_v45, %v5307_v4 }
 0x167   : > { %v5272_v48 = vadd.f32 %v5271_v58, %v5270_v35  ;;  %v5310_v62 = vpop.f32.mrf.mxu1 }
 0x168   : > { %v5273_v15 = vpop.f32.mrf.mxu0  ;;  %v2608_v17 = vadd.f32 %v5309_v18, %v5269_v38 }
 0x169   : > { %v5311_v8 = vpop.f32.mrf.mxu1 }
 0x16a   : > { %v5274_v55 = vpop.f32.mrf.mxu0  ;;  %v7990_v6 = vadd.f32 %v2608_v17, %v7952_v14  ;;  %v5312_v21 = vadd.f32 %v5311_v8, %v5310_v62 }
 0x16b   : > { %v5275_v33 = vadd.f32 %v5274_v55, %v5273_v15  ;;  %v5313_v41 = vpop.f32.mrf.mxu1 }
 0x16c   : > { %v5276_v49 = vpop.f32.mrf.mxu0  ;;  %v2611_v7 = vadd.f32 %v5312_v21, %v5272_v48 }
 0x16d   : > { %v5314_v3 = vpop.f32.mrf.mxu1 }
 0x16e   : > { %v5277_v1 = vpop.f32.mrf.mxu0  ;;  %v7993_v16 = vadd.f32 %v2611_v7, %v7963_v59  ;;  %v5315_v43 = vadd.f32 %v5314_v3, %v5313_v41 }
 0x16f   : > { %v5278_v54 = vadd.f32 %v5277_v1, %v5276_v49  ;;  %v5316_v24 = vpop.f32.mrf.mxu1 }
 0x170   : > { %v5279_v5 = vpop.f32.mrf.mxu0  ;;  %v2616_v20 = vadd.f32 %v5315_v43, %v5275_v33 }
 0x171   : > { %v5317_v31 = vpop.f32.mrf.mxu1 }
 0x172   : > { %v5280_v40 = vpop.f32.mrf.mxu0  ;;  %v7996_v14 = vadd.f32 %v2616_v20, %v7968_v51  ;;  %v5318_v37 = vadd.f32 %v5317_v31, %v5316_v24 }
 0x173   : > { %v5281_v11 = vadd.f32 %v5280_v40, %v5279_v5  ;;  %v5319_v61 = vpop.f32.mrf.mxu1 }
 0x174   : > { %v5282_v36 = vpop.f32.mrf.mxu0  ;;  %v2619_v44 = vadd.f32 %v5318_v37, %v5278_v54 }
 0x175   : > { %v5320_v0 = vpop.f32.mrf.mxu1 }
 0x176   : > { %v5283_v2 = vpop.f32.mrf.mxu0  ;;  %v7999_v59 = vadd.f32 %v2619_v44, %v7973_v57  ;;  %v5321_v27 = vadd.f32 %v5320_v0, %v5319_v61 }
 0x177   : > { %v5284_v22 = vadd.f32 %v5283_v2, %v5282_v36  ;;  %v5322_v19 = vpop.f32.mrf.mxu1 }
 0x178   : > { %v5285_v63 = vpop.f32.mrf.mxu0  ;;  %v2624_v60 = vadd.f32 %v5321_v27, %v5281_v11 }
 0x179   : > { %v5323_v52 = vpop.f32.mrf.mxu1 }
 0x17a   : > { %v5286_v25 = vpop.f32.mrf.mxu0  ;;  %v8002_v51 = vadd.f32 %v2624_v60, %v7978_v12  ;;  %v5324_v13 = vadd.f32 %v5323_v52, %v5322_v19 }
 0x17b   : > { %v5287_v50 = vadd.f32 %v5286_v25, %v5285_v63  ;;  %v5325_v53 = vpop.f32.mrf.mxu1 }
 0x17c   : > { %v5288_v46 = vpop.f32.mrf.mxu0  ;;  %v2627_v29 = vadd.f32 %v5324_v13, %v5284_v22 }
 0x17d   : > { %v5326_v30 = vpop.f32.mrf.mxu1 }
 0x17e   : > { %v5289_v32 = vpop.f32.mrf.mxu0  ;;  %v8005_v57 = vadd.f32 %v2627_v29, %v7981_v9  ;;  %v5327_v39 = vadd.f32 %v5326_v30, %v5325_v53 }
 0x17f   : > { %v5290_v56 = vadd.f32 %v5289_v32, %v5288_v46  ;;  %v5328_v28 = vpop.f32.mrf.mxu1 }
 0x180   : > { %v5347_v47 = vpop.f32.mrf.mxu0  ;;  %v2632_v42 = vadd.f32 %v5327_v39, %v5287_v50 }
 0x181   : > { %v5329_v23 = vpop.f32.mrf.mxu1 }
 0x182   : > { %v5348_v38 = vpop.f32.mrf.mxu0  ;;  %v8008_v12 = vadd.f32 %v2632_v42, %v7984_v10  ;;  %v5330_v4 = vadd.f32 %v5329_v23, %v5328_v28 }
 0x183   : > { %v5349_v35 = vadd.f32 %v5348_v38, %v5347_v47  ;;  %v5387_v26 = vpop.f32.mrf.mxu1 }
 0x184   : > { %v5350_v45 = vpop.f32.mrf.mxu0  ;;  %v2635_v58 = vadd.f32 %v5330_v4, %v5290_v56 }
 0x185   : > { %v5388_v18 = vpop.f32.mrf.mxu1 }
 0x186   : > { %v5351_v48 = vpop.f32.mrf.mxu0  ;;  %v8011_v9 = vadd.f32 %v2635_v58, %v7987_v34  ;;  %v5389_v62 = vadd.f32 %v5388_v18, %v5387_v26 }
 0x187   : > { %v5352_v15 = vadd.f32 %v5351_v48, %v5350_v45  ;;  %v5390_v17 = vpop.f32.mrf.mxu1 }
 0x188   : > { %v5353_v8 = vpop.f32.mrf.mxu0  ;;  %v3002_v55 = vadd.f32 %v5389_v62, %v5349_v35 }
 0x189   : > { %v5391_v21 = vpop.f32.mrf.mxu1 }
 0x18a   : > { %v5354_v33 = vpop.f32.mrf.mxu0  ;;  %v8014_v10 = vadd.f32 %v3002_v55, %v7990_v6  ;;  %v5392_v41 = vadd.f32 %v5391_v21, %v5390_v17 }
 0x18b   : > { %v5355_v49 = vadd.f32 %v5354_v33, %v5353_v8  ;;  %v5393_v7 = vpop.f32.mrf.mxu1 }
 0x18c   : > { %v5356_v3 = vpop.f32.mrf.mxu0  ;;  %v3005_v1 = vadd.f32 %v5392_v41, %v5352_v15 }
 0x18d   : > { %v5394_v43 = vpop.f32.mrf.mxu1 }
 0x18e   : > { %v5357_v54 = vpop.f32.mrf.mxu0  ;;  %v8017_v34 = vadd.f32 %v3005_v1, %v7993_v16  ;;  %v5395_v24 = vadd.f32 %v5394_v43, %v5393_v7 }
 0x18f   : > { %v5358_v5 = vadd.f32 %v5357_v54, %v5356_v3  ;;  %v5396_v20 = vpop.f32.mrf.mxu1 }
 0x190   : > { %v5359_v31 = vpop.f32.mrf.mxu0  ;;  %v3010_v40 = vadd.f32 %v5395_v24, %v5355_v49 }
 0x191   : > { %v5397_v37 = vpop.f32.mrf.mxu1 }
 0x192   : > { %v5360_v11 = vpop.f32.mrf.mxu0  ;;  %v8020_v6 = vadd.f32 %v3010_v40, %v7996_v14  ;;  %v5398_v61 = vadd.f32 %v5397_v37, %v5396_v20 }
 0x193   : > { %v5361_v36 = vadd.f32 %v5360_v11, %v5359_v31  ;;  %v5399_v44 = vpop.f32.mrf.mxu1 }
 0x194   : > { %v5362_v0 = vpop.f32.mrf.mxu0  ;;  %v3013_v2 = vadd.f32 %v5398_v61, %v5358_v5 }
 0x195   : > { %v5400_v27 = vpop.f32.mrf.mxu1 }
 0x196   : > { %v5363_v22 = vpop.f32.mrf.mxu0  ;;  %v8023_v16 = vadd.f32 %v3013_v2, %v7999_v59  ;;  %v5401_v19 = vadd.f32 %v5400_v27, %v5399_v44 }
 0x197   : > { %v5364_v63 = vadd.f32 %v5363_v22, %v5362_v0  ;;  %v5402_v60 = vpop.f32.mrf.mxu1 }
 0x198   : > { %v3018_v52 = vadd.f32 %v5401_v19, %v5361_v36  ;;  %v5365_v13 = vpop.f32.mrf.mxu0 }
 0x199   : > { %v5403_v25 = vpop.f32.mrf.mxu1 }
 0x19a   : > { %v8026_v50 = vadd.f32 %v3018_v52, %v8002_v51  ;;  %v5404_v14 = vadd.f32 %v5403_v25, %v5402_v60  ;;  %v5366_v46 = vpop.f32.mrf.mxu0 }
 0x19b   : > { %v5405_v53 = vpop.f32.mrf.mxu1  ;;  %v5367_v30 = vadd.f32 %v5366_v46, %v5365_v13 }
 0x19c   : > { %v3021_v29 = vadd.f32 %v5404_v14, %v5364_v63  ;;  %v5368_v39 = vpop.f32.mrf.mxu0 }
 0x19d   : > { %v5406_v32 = vpop.f32.mrf.mxu1 }
 0x19e   : > { %v8029_v56 = vadd.f32 %v3021_v29, %v8005_v57  ;;  %v5407_v59 = vadd.f32 %v5406_v32, %v5405_v53  ;;  %v5369_v47 = vpop.f32.mrf.mxu0 }
 0x19f   : > { %v5408_v28 = vpop.f32.mrf.mxu1  ;;  %v5370_v23 = vadd.f32 %v5369_v47, %v5368_v39 }
 0x1a0   : > { %v3026_v42 = vadd.f32 %v5407_v59, %v5367_v30  ;;  %v5427_v4 = vpop.f32.mrf.mxu0 }
 0x1a1   : > { %v5409_v38 = vpop.f32.mrf.mxu1 }
 0x1a2   : > { %v8032_v51 = vadd.f32 %v3026_v42, %v8008_v12  ;;  %v5410_v35 = vadd.f32 %v5409_v38, %v5408_v28  ;;  %v5428_v45 = vpop.f32.mrf.mxu0 }
 0x1a3   : > { %v5467_v26 = vpop.f32.mrf.mxu1  ;;  %v5429_v18 = vadd.f32 %v5428_v45, %v5427_v4 }
 0x1a4   : > { %v3029_v58 = vadd.f32 %v5410_v35, %v5370_v23  ;;  %v5430_v62 = vpop.f32.mrf.mxu0 }
 0x1a5   : > { %v5468_v48 = vpop.f32.mrf.mxu1 }
 0x1a6   : > { %v8035_v57 = vadd.f32 %v3029_v58, %v8011_v9  ;;  %v5469_v15 = vadd.f32 %v5468_v48, %v5467_v26  ;;  %v5431_v8 = vpop.f32.mrf.mxu0 }
 0x1a7   : > { %v5470_v17 = vpop.f32.mrf.mxu1  ;;  %v5432_v21 = vadd.f32 %v5431_v8, %v5430_v62 }
 0x1a8   : > { %v3378_v55 = vadd.f32 %v5469_v15, %v5429_v18  ;;  %v5433_v41 = vpop.f32.mrf.mxu0 }
 0x1a9   : > { %v5471_v33 = vpop.f32.mrf.mxu1 }
 0x1aa   : > { %v8038_v12 = vadd.f32 %v3378_v55, %v8014_v10  ;;  %v5472_v49 = vadd.f32 %v5471_v33, %v5470_v17  ;;  %v5434_v3 = vpop.f32.mrf.mxu0 }
 0x1ab   : > { %v5473_v7 = vpop.f32.mrf.mxu1  ;;  %v5435_v43 = vadd.f32 %v5434_v3, %v5433_v41 }
 0x1ac   : > { %v3381_v1 = vadd.f32 %v5472_v49, %v5432_v21  ;;  %v5436_v24 = vpop.f32.mrf.mxu0 }
 0x1ad   : > { %v5474_v54 = vpop.f32.mrf.mxu1 }
 0x1ae   : > { %v8041_v9 = vadd.f32 %v3381_v1, %v8017_v34  ;;  %v5475_v5 = vadd.f32 %v5474_v54, %v5473_v7  ;;  %v5437_v31 = vpop.f32.mrf.mxu0 }
 0x1af   : > { %v5476_v20 = vpop.f32.mrf.mxu1  ;;  %v5438_v37 = vadd.f32 %v5437_v31, %v5436_v24 }
 0x1b0   : > { %v3386_v40 = vadd.f32 %v5475_v5, %v5435_v43  ;;  %v5439_v61 = vpop.f32.mrf.mxu0 }
 0x1b1   : > { %v5477_v11 = vpop.f32.mrf.mxu1 }
 0x1b2   : > { %v8044_v10 = vadd.f32 %v3386_v40, %v8020_v6  ;;  %v5478_v36 = vadd.f32 %v5477_v11, %v5476_v20  ;;  %v5440_v0 = vpop.f32.mrf.mxu0 }
 0x1b3   : > { %v5479_v44 = vpop.f32.mrf.mxu1  ;;  %v5441_v27 = vadd.f32 %v5440_v0, %v5439_v61 }
 0x1b4   : > { %v3389_v2 = vadd.f32 %v5478_v36, %v5438_v37  ;;  %v5442_v19 = vpop.f32.mrf.mxu0 }
 0x1b5   : > { %v5480_v22 = vpop.f32.mrf.mxu1 }
 0x1b6   : > { %v8047_v34 = vadd.f32 %v3389_v2, %v8023_v16  ;;  %v5481_v63 = vadd.f32 %v5480_v22, %v5479_v44  ;;  %v5443_v52 = vpop.f32.mrf.mxu0 }
 0x1b7   : > { %v5482_v60 = vpop.f32.mrf.mxu1  ;;  %v5444_v13 = vadd.f32 %v5443_v52, %v5442_v19 }
 0x1b8   : > { %v3394_v25 = vadd.f32 %v5481_v63, %v5441_v27  ;;  %v5445_v53 = vpop.f32.mrf.mxu0 }
 0x1b9   : > { %v5483_v14 = vpop.f32.mrf.mxu1 }
 0x1ba   : > { %v8050_v6 = vadd.f32 %v3394_v25, %v8026_v50  ;;  %v5484_v46 = vadd.f32 %v5483_v14, %v5482_v60  ;;  %v5446_v30 = vpop.f32.mrf.mxu0 }
 0x1bb   : > { %v5485_v29 = vpop.f32.mrf.mxu1  ;;  %v5447_v39 = vadd.f32 %v5446_v30, %v5445_v53 }
 0x1bc   : > { %8417 = vst [vmem:[#allocation5_spill] sm:$0xff] %v8050_v6  ;;  %v3397_v32 = vadd.f32 %v5484_v46, %v5444_v13  ;;  %v5448_v28 = vpop.f32.mrf.mxu0 }
 0x1bd   : > { %v5486_v59 = vpop.f32.mrf.mxu1 }
 0x1be   : > { %v8053_v16 = vadd.f32 %v3397_v32, %v8029_v56  ;;  %v5487_v47 = vadd.f32 %v5486_v59, %v5485_v29  ;;  %v5449_v23 = vpop.f32.mrf.mxu0 }
 0x1bf   : > { %v5488_v42 = vpop.f32.mrf.mxu1  ;;  %v5450_v4 = vadd.f32 %v5449_v23, %v5448_v28 }
 0x1c0   : > { %8418 = vst [vmem:[#allocation6_spill] sm:$0xff] %v8053_v16  ;;  %v3402_v38 = vadd.f32 %v5487_v47, %v5447_v39  ;;  %v8055_v26 = vpop.f32.mrf.mxu0 }
 0x1c1   : > { %v5489_v35 = vpop.f32.mrf.mxu1 }
 0x1c2   : > { %v8058_v50 = vadd.f32 %v3402_v38, %v8032_v51  ;;  %v5490_v45 = vadd.f32 %v5489_v35, %v5488_v42  ;;  %v5508_v18 = vpop.f32.mrf.mxu0 }
 0x1c3   : > { %v5547_v58 = vpop.f32.mrf.mxu1 }
 0x1c4   : > { %8419 = vst [vmem:[#allocation7_spill] sm:$0xff] %v8058_v50  ;;  %v3405_v48 = vadd.f32 %v5490_v45, %v5450_v4  ;;  %v8060_v15 = vpop.f32.mrf.mxu0 }
 0x1c5   : > { %v5548_v62 = vpop.f32.mrf.mxu1 }
 0x1c6   : > { %v8063_v56 = vadd.f32 %v3405_v48, %v8035_v57  ;;  %v8067_v8 = vpop.f32.mrf.mxu0 }
 0x1c7   : > { %v8065_v17 = vpop.f32.mrf.mxu1 }
 0x1c8   : > { %8420 = vst [vmem:[#allocation21_spill] sm:$0xff] %v8063_v56  ;;  %v8071_v21 = vpop.f32.mrf.mxu0 }
 0x1c9   : > { %v8069_v55 = vpop.f32.mrf.mxu1 }
 0x1ca   : > { %v8075_v33 = vpop.f32.mrf.mxu0 }
 0x1cb   : > { %v8073_v51 = vpop.f32.mrf.mxu1 }
 0x1cc   : > { %v8079_v49 = vpop.f32.mrf.mxu0 }
 0x1cd   : > { %v8077_v41 = vpop.f32.mrf.mxu1 }
 0x1ce   : > { %v8083_v57 = vpop.f32.mrf.mxu0 }
 0x1cf   : > { %v8081_v7 = vpop.f32.mrf.mxu1 }
 0x1d0   : > { %v8087_v1 = vpop.f32.mrf.mxu0 }
 0x1d1   : > { %v8085_v3 = vpop.f32.mrf.mxu1 }
 0x1d2   : > { %v8091_v54 = vpop.f32.mrf.mxu0 }
 0x1d3   : > { %v8089_v43 = vpop.f32.mrf.mxu1 }
 0x1d4   : > { %v8095_v5 = vpop.f32.mrf.mxu0 }
 0x1d5   : > { %v8093_v24 = vpop.f32.mrf.mxu1 }
 0x1d6   : > { %v8099_v31 = vpop.f32.mrf.mxu0 }
 0x1d7   : > { %v8097_v20 = vpop.f32.mrf.mxu1 }
 0x1d8   : > { %v8103_v37 = vpop.f32.mrf.mxu0 }
 0x1d9   : > { %v8101_v40 = vpop.f32.mrf.mxu1  ;;  %8421 = vst [vmem:[#allocation20_spill] sm:$0xff] %v8103_v37 }
 0x1da   : > { %v8107_v61 = vpop.f32.mrf.mxu0 }
 0x1db   : > { %v8105_v11 = vpop.f32.mrf.mxu1  ;;  %8423 = vst [vmem:[#allocation23_spill] sm:$0xff] %v8107_v61 }
 0x1dc   : > { %8422 = vst [vmem:[#allocation22_spill] sm:$0xff] %v8105_v11  ;;  %v8111_v44 = vpop.f32.mrf.mxu0 }
 0x1dd   : > { %v8109_v36 = vpop.f32.mrf.mxu1  ;;  %8425 = vst [vmem:[#allocation25_spill] sm:$0xff] %v8111_v44  ;;  %v5549_v44 = vadd.f32 %v5548_v62, %v5547_v58 }
 0x1de   : > { %8424 = vst [vmem:[#allocation24_spill] sm:$0xff] %v8109_v36  ;;  %v8115_v2 = vpop.f32.mrf.mxu0 }
 0x1df   : > { %v8113_v0 = vpop.f32.mrf.mxu1  ;;  %8427 = vst [vmem:[#allocation27_spill] sm:$0xff] %v8115_v2  ;;  %v5509_v2 = vadd.f32 %v5508_v18, %v8055_v26 }
 0x1e0   : > { %8426 = vst [vmem:[#allocation26_spill] sm:$0xff] %v8113_v0  ;;  %v5587_v22 = vpop.f32.mrf.mxu0 }
 0x1e1   : > { %v8117_v27 = vpop.f32.mrf.mxu1 }
 0x1e2   : > { %8428 = vst [vmem:[#allocation28_spill] sm:$0xff] %v8117_v27  ;;  %v5588_v63 = vpop.f32.mrf.mxu0 }
 0x1e3   : > { %v5627_v19 = vpop.f32.mrf.mxu1  ;;  %v5589_v36 = vadd.f32 %v5588_v63, %v5587_v22  ;;  %v5555_v63 = vadd.f32 %v8077_v41, %v8073_v51  ;;  %v5518_v51 = vadd.f32 %v8083_v57, %v8079_v49  ;;  %v5558_v41 = vadd.f32 %v8085_v3, %v8081_v7 }
 0x1e4   : > { %v5590_v52 = vpop.f32.mrf.mxu0 }
 0x1e5   : > { %v5628_v60 = vpop.f32.mrf.mxu1 }
 0x1e6   : > { %v5591_v13 = vpop.f32.mrf.mxu0  ;;  %v5629_v11 = vadd.f32 %v5628_v60, %v5627_v19  ;;  %v5515_v19 = vadd.f32 %v8075_v33, %v8071_v21 }
 0x1e7   : > { %v5630_v25 = vpop.f32.mrf.mxu1  ;;  %v5592_v62 = vadd.f32 %v5591_v13, %v5590_v52 }
 0x1e8   : > { %v5593_v53 = vpop.f32.mrf.mxu0  ;;  %v4092_v18 = vadd.f32 %v5629_v11, %v5589_v36  ;;  %v3730_v33 = vadd.f32 %v5555_v63, %v5515_v19  ;;  %v5561_v19 = vadd.f32 %v8093_v24, %v8089_v43 }
 0x1e9   : > { %v5631_v14 = vpop.f32.mrf.mxu1 }
 0x1ea   : > { %v5594_v29 = vpop.f32.mrf.mxu0 }
 0x1eb   : > { %v5633_v46 = vpop.f32.mrf.mxu1  ;;  %v5595_v60 = vadd.f32 %v5594_v29, %v5593_v53 }
 0x1ec   : > { %v5596_v32 = vpop.f32.mrf.mxu0 }
 0x1ed   : > { %v5634_v30 = vpop.f32.mrf.mxu1 }
 0x1ee   : > { %v5597_v59 = vpop.f32.mrf.mxu0  ;;  %v5635_v11 = vadd.f32 %v5634_v30, %v5633_v46 }
 0x1ef   : > { %v5636_v39 = vpop.f32.mrf.mxu1  ;;  %v5598_v29 = vadd.f32 %v5597_v59, %v5596_v32 }
 0x1f0   : > { %v8119_v47 = vpop.f32.mrf.mxu0  ;;  %v4100_v46 = vadd.f32 %v5635_v11, %v5595_v60 }
 0x1f1   : > { %v5637_v28 = vpop.f32.mrf.mxu1 }
 0x1f2   : > { %v8123_v23 = vpop.f32.mrf.mxu0  ;;  %v5638_v30 = vadd.f32 %v5637_v28, %v5636_v39 }
 0x1f3   : > { %v8121_v42 = vpop.f32.mrf.mxu1 }
 0x1f4   : > { %v8127_v4 = vpop.f32.mrf.mxu0 }
 0x1f5   : > { %v8125_v38 = vpop.f32.mrf.mxu1 }
 0x1f6   : > { %v8131_v45 = vpop.f32.mrf.mxu0 }
 0x1f7   : > { %v8129_v35 = vpop.f32.mrf.mxu1 }
 0x1f9   : > { %v8133_v48 = vpop.f32.mrf.mxu1  ;;  %v8135_v56 = vpop.f32.mrf.mxu0 }
 0x1fa   : > { %8429 = vst [vmem:[#allocation8_spill] sm:$0xff] %v8135_v56  ;;  %v3722_v56 = vadd.f32 %v5549_v44, %v5509_v2 }
 0x1fb   : > { %v8137_v50 = vpop.f32.mrf.mxu1  ;;  %v8139_v27 = vpop.f32.mrf.mxu0 }
 0x1fc   : > { %8430 = vst [vmem:[#allocation10_spill] sm:$0xff] %v8137_v50  ;;  %v5512_v50 = vadd.f32 %v8067_v8, %v8060_v15  ;;  %v3752_v15 = vadd.f32 %v3722_v56, %v8038_v12  ;;  %v8171_v12 = vld [vmem:[%s8291_s2] ss:$0 sm:$0xff] }
 0x1fd   : > { %v8141_v0 = vpop.f32.mrf.mxu1  ;;  %v8144_v16 = vpop.f32.mrf.mxu0 }
 0x1fe   : > { %8431 = vst [vmem:[#allocation9_spill] sm:$0xff] %v8141_v0  ;;  %8432 = vst [vmem:[#allocation12_spill] sm:$0xff] %v8144_v16  ;;  %v5552_v0 = vadd.f32 %v8069_v55, %v8065_v17  ;;  %v5632_v16 = vadd.f32 %v5631_v14, %v5630_v25  ;;  %v4122_v52 = vadd.f32 %v4092_v18, %v3752_v15 }
 0x1ff   : > { %v8146_v6 = vpop.f32.mrf.mxu1  ;;  %v8148_v61 = vpop.f32.mrf.mxu0  ;;  %v3733_v18 = vadd.f32 %v5558_v41, %v5518_v51  ;;  %v5564_v15 = vadd.f32 %v8101_v40, %v8097_v20  ;;  %v8436_v51 = vld [vmem:[#allocation24_spill] sm:$0xff] }
 0x200   : > { %v3725_v8 = vadd.f32 %v5552_v0, %v5512_v50  ;;  %v4095_v25 = vadd.f32 %v5632_v16, %v5592_v62 }
 0x201   : > { %v8150_v37 = vpop.f32.mrf.mxu1  ;;  %v5667_v26 = vpop.f32.mrf.mxu0 }
 0x202   : > { %v3753_v16 = vadd.f32 %v3725_v8, %v8041_v9  ;;  %v5521_v9 = vadd.f32 %v8091_v54, %v8087_v1  ;;  %v5641_v1 = vadd.f32 %v8125_v38, %v8121_v42  ;;  %v5604_v38 = vadd.f32 %v8131_v45, %v8127_v4  ;;  %v8437_v4 = vld [vmem:[#allocation5_spill] sm:$0xff] }
 0x203   : > { %v5707_v58 = vpop.f32.mrf.mxu1  ;;  %v5668_v22 = vpop.f32.mrf.mxu0 }
 0x204   : > { %v5669_v44 = vadd.f32 %v5668_v22, %v5667_v26  ;;  %v4123_v57 = vadd.f32 %v4095_v25, %v3753_v16  ;;  %v3738_v60 = vadd.f32 %v5561_v19, %v5521_v9  ;;  %v8433_v25 = vld [vmem:[#allocation20_spill] sm:$0xff]  ;;  %v8442_v19 = vld [vmem:[#allocation25_spill] sm:$0xff] }
 0x205   : > { %v5708_v2 = vpop.f32.mrf.mxu1  ;;  %v5670_v55 = vpop.f32.mrf.mxu0 }
 0x206   : > { %v5709_v17 = vadd.f32 %v5708_v2, %v5707_v58  ;;  %v3754_v58 = vadd.f32 %v3730_v33, %v8044_v10  ;;  %v4103_v10 = vadd.f32 %v5638_v30, %v5598_v29  ;;  %v5524_v2 = vadd.f32 %v8099_v31, %v8095_v5  ;;  %v8435_v33 = vld [vmem:[#allocation22_spill] sm:$0xff]  ;;  %v8440_v29 = vld [vmem:[#allocation9_spill] sm:$0xff] }
 0x207   : > { %v5710_v36 = vpop.f32.mrf.mxu1  ;;  %v5671_v21 = vpop.f32.mrf.mxu0  ;;  %v5644_v5 = vadd.f32 %v8133_v48, %v8129_v35  ;;  %v5567_v41 = vadd.f32 %v8436_v51, %v8435_v33  ;;  %v3756_v45 = vadd.f32 %v3738_v60, %v8437_v4 }
 0x208   : > { %v4444_v13 = vadd.f32 %v5709_v17, %v5669_v44  ;;  %v5672_v50 = vadd.f32 %v5671_v21, %v5670_v55  ;;  %v4124_v28 = vadd.f32 %v4100_v46, %v3754_v58  ;;  %v5601_v44 = vadd.f32 %v8123_v23, %v8119_v47  ;;  %v8439_v46 = vld [vmem:[#allocation10_spill] sm:$0xff] }
 0x209   : > { %v5711_v56 = vpop.f32.mrf.mxu1  ;;  %v5673_v53 = vpop.f32.mrf.mxu0  ;;  %v3755_v55 = vadd.f32 %v3733_v18, %v8047_v34  ;;  %v5647_v30 = vadd.f32 %v8440_v29, %v8439_v46  ;;  %v8441_v58 = vld [vmem:[#allocation6_spill] sm:$0xff] }
 0x20a   : > { %v4474_v0 = vadd.f32 %v4444_v13, %v4122_v52  ;;  %v5712_v14 = vadd.f32 %v5711_v56, %v5710_v36  ;;  %v4108_v20 = vadd.f32 %v5641_v1, %v5601_v44  ;;  %v3741_v52 = vadd.f32 %v5564_v15, %v5524_v2  ;;  %v8434_v13 = vld [vmem:[#allocation23_spill] sm:$0xff] }
 0x20b   : > { %v5713_v49 = vpop.f32.mrf.mxu1  ;;  %v5674_v26 = vpop.f32.mrf.mxu0  ;;  %v4125_v11 = vadd.f32 %v4103_v10, %v3755_v55  ;;  %v5527_v21 = vadd.f32 %v8434_v13, %v8433_v25  ;;  %v5650_v15 = vadd.f32 %v8150_v37, %v8146_v6  ;;  %v8448_v25 = vld [vmem:[#allocation21_spill] sm:$0xff] }
 0x20c   : > { %v4489_v7 = vadd.f32 %v8171_v12, %v4474_v0  ;;  %v4447_v3 = vadd.f32 %v5712_v14, %v5672_v50  ;;  %v5675_v62 = vadd.f32 %v5674_v26, %v5673_v53  ;;  %v4111_v0 = vadd.f32 %v5644_v5, %v5604_v38  ;;  %v8438_v14 = vld [vmem:[#allocation8_spill] sm:$0xff] }
 0x20d   : > { %v5714_v22 = vpop.f32.mrf.mxu1  ;;  %v5676_v59 = vpop.f32.mrf.mxu0  ;;  %v5607_v53 = vadd.f32 %v8139_v27, %v8438_v14  ;;  %v3757_v18 = vadd.f32 %v3741_v52, %v8441_v58 }
 0x20e   : > { %4498 = vst.msk [vmem:[%s8180_s25] sm:$0xff] %vm4497_vm6, %v4489_v7  ;;  %v4475_v32 = vadd.f32 %v4447_v3, %v4123_v57  ;;  %v5715_v39 = vadd.f32 %v5714_v22, %v5713_v49  ;;  %v4126_v57 = vadd.f32 %v4108_v20, %v3756_v45 }
 0x20f   : > { %v5716_v63 = vpop.f32.mrf.mxu1  ;;  %v5677_v24 = vpop.f32.mrf.mxu0  ;;  %v4127_v1 = vadd.f32 %v4111_v0, %v3757_v18 }
 0x210   : > { %v4490_v43 = vadd.f32 %v8171_v12, %v4475_v32  ;;  %v4452_v54 = vadd.f32 %v5715_v39, %v5675_v62  ;;  %v5678_v8 = vadd.f32 %v5677_v24, %v5676_v59  ;;  %v3746_v62 = vadd.f32 %v5567_v41, %v5527_v21  ;;  %v8443_v32 = vld [vmem:[#allocation27_spill] sm:$0xff]  ;;  %v8444_v59 = vld [vmem:[#allocation26_spill] sm:$0xff]  ;;  %v8446_v24 = vld [vmem:[#allocation12_spill] sm:$0xff] }
 0x211   : > { %v5717_v17 = vpop.f32.mrf.mxu1  ;;  %v5679_v42 = vpop.f32.mrf.mxu0  ;;  %v5530_v39 = vadd.f32 %v8443_v32, %v8442_v19  ;;  %v5610_v2 = vadd.f32 %v8148_v61, %v8446_v24 }
 0x212   : > { %4499 = vst.msk [vmem:[%s8180_s25 + $0x8] sm:$0xff] %vm4497_vm6, %v4490_v43  ;;  %v4476_v47 = vadd.f32 %v4452_v54, %v4124_v28  ;;  %v5718_v23 = vadd.f32 %v5717_v17, %v5716_v63  ;;  %v8445_v28 = vld [vmem:[#allocation28_spill] sm:$0xff]  ;;  %v4116_v43 = vadd.f32 %v5647_v30, %v5607_v53 }
 0x213   : > { %v5719_v31 = vpop.f32.mrf.mxu1  ;;  %v5680_v34 = vpop.f32.mrf.mxu0  ;;  %v5570_v27 = vadd.f32 %v8445_v28, %v8444_v59  ;;  %v4119_v6 = vadd.f32 %v5650_v15, %v5610_v2 }
 0x214   : > { %v4491_v40 = vadd.f32 %v8171_v12, %v4476_v47  ;;  %v4455_v36 = vadd.f32 %v5718_v23, %v5678_v8  ;;  %v5681_v50 = vadd.f32 %v5680_v34, %v5679_v42  ;;  %v8447_v23 = vld [vmem:[#allocation7_spill] sm:$0xff] }
 0x215   : > { %v5720_v56 = vpop.f32.mrf.mxu1  ;;  %v5682_v16 = vpop.f32.mrf.mxu0  ;;  %v3758_v42 = vadd.f32 %v3746_v62, %v8447_v23  ;;  %v3749_v38 = vadd.f32 %v5570_v27, %v5530_v39 }
 0x216   : > { %4500 = vst.msk [vmem:[%s8180_s25 + $0x10] sm:$0xff] %vm4497_vm6, %v4491_v40  ;;  %v4477_v35 = vadd.f32 %v4455_v36, %v4125_v11  ;;  %v5721_v48 = vadd.f32 %v5720_v56, %v5719_v31 }
 0x217   : > { %v5722_v49 = vpop.f32.mrf.mxu1  ;;  %v5683_v26 = vpop.f32.mrf.mxu0  ;;  %v4128_v20 = vadd.f32 %v4116_v43, %v3758_v42  ;;  %v3759_v13 = vadd.f32 %v3749_v38, %v8448_v25 }
 0x218   : > { %v4492_v7 = vadd.f32 %v8171_v12, %v4477_v35  ;;  %v4460_v3 = vadd.f32 %v5721_v48, %v5681_v50  ;;  %v5684_v22 = vadd.f32 %v5683_v26, %v5682_v16 }
 0x219   : > { %v5723_v9 = vpop.f32.mrf.mxu1  ;;  %v5685_v44 = vpop.f32.mrf.mxu0  ;;  %v4129_v51 = vadd.f32 %v4119_v6, %v3759_v13 }
 0x21a   : > { %4501 = vst.msk [vmem:[%s8180_s25 + $0x18] sm:$0xff] %vm4497_vm6, %v4492_v7  ;;  %v4478_v10 = vadd.f32 %v4460_v3, %v4126_v57  ;;  %v5724_v63 = vadd.f32 %v5723_v9, %v5722_v49 }
 0x21b   : > { %v5725_v54 = vpop.f32.mrf.mxu1  ;;  %v5686_v55 = vpop.f32.mrf.mxu0 }
 0x21c   : > { %v4493_v8 = vadd.f32 %v8171_v12, %v4478_v10  ;;  %v4463_v17 = vadd.f32 %v5724_v63, %v5684_v22  ;;  %v5687_v60 = vadd.f32 %v5686_v55, %v5685_v44 }
 0x21d   : > { %v5726_v47 = vpop.f32.mrf.mxu1  ;;  %v5688_v11 = vpop.f32.mrf.mxu0 }
 0x21e   : > { %4502 = vst.msk [vmem:[%s8180_s25 + $0x20] sm:$0xff] %vm4497_vm6, %v4493_v8  ;;  %v4479_v5 = vadd.f32 %v4463_v17, %v4127_v1  ;;  %v5727_v31 = vadd.f32 %v5726_v47, %v5725_v54 }
 0x21f   : > { %v5728_v61 = vpop.f32.mrf.mxu1  ;;  %v5689_v36 = vpop.f32.mrf.mxu0 }
 0x220   : > { %v4494_v37 = vadd.f32 %v8171_v12, %v4479_v5  ;;  %v4468_v40 = vadd.f32 %v5727_v31, %v5687_v60  ;;  %v5690_v34 = vadd.f32 %v5689_v36, %v5688_v11 }
 0x221   : > { %v5729_v52 = vpop.f32.mrf.mxu1 }
 0x222   : > { %4503 = vst.msk [vmem:[%s8180_s25 + $0x28] sm:$0xff] %vm4497_vm6, %v4494_v37  ;;  %v4480_v21 = vadd.f32 %v4468_v40, %v4128_v20  ;;  %v5730_v33 = vadd.f32 %v5729_v52, %v5728_v61 }
 0x224   : > { %v4495_v41 = vadd.f32 %v8171_v12, %v4480_v21  ;;  %v4471_v50 = vadd.f32 %v5730_v33, %v5690_v34 }
 0x226   : > { %4504 = vst.msk [vmem:[%s8180_s25 + $0x30] sm:$0xff] %vm4497_vm6, %v4495_v41  ;;  %v4481_v56 = vadd.f32 %v4471_v50, %v4129_v51 }
 0x228   : > { %v4496_v4 = vadd.f32 %v8171_v12, %v4481_v56 }
 0x22a   : > { %4505 = vst.msk [vmem:[%s8180_s25 + $0x38] sm:$0xff] %vm4497_vm6, %v4496_v4 }
 0x22b   : > { %6078 = shalt.err (!%p6075_p3)
}
 0x22c   : > { %s6079_s9 = scalar_lea.hbm %s8240_s30, 1024  ;;  %s6083_s17 = scalar_lea.hbm %s8292_s3, 2048 }
 0x22d   : > { %p6080_p4 = scmp.ne.s32.totalorder %s8240_s30, %s6079_s9  ;;  %p6084_p9 = scmp.lt.s32.totalorder %s8240_s30, %s8292_s3 }
 0x22e   : > { %p6085_p10 = scmp.lt.s32.totalorder %s6083_s17, %s6079_s9 }
 0x22f   : > { %p6081_p7 = pnand %p6080_p4, %p6188_p5 }
 0x230   : > { %p6086_p11 = por %p6085_p10, %p6084_p9 }
 0x231   : > { %p6082_p8 = pneg %p6081_p7 }
 0x233   : > { %p6087_p12 = pnand %p6086_p11, %p6082_p8 }
 0x235   : > { %6090 = shalt.err (!%p6087_p12)
}
 0x236   : > { %s6128_s7 = smov 128   ;;  %s6129_s24 = smov 8  }
 0x237   : > { %5732 = dma.vmem_to_hbm [thread:$0]  (%p6188_p5), %s8242_s27, 1024, %s8240_s30, %s8249_s16, %s6128_s7, %s6128_s7, %s6129_s24  }
 0x238 PF: > { %p5738_p13 = scmp.ge.s32.totalorder %s6125_s15, 2  ;;  %s4535_s25 = sand.u32 1, %s6113_s12  }
 0x239   : > { %s4536_s26 = scalar_lea.sflag [#allocation3], %s4535_s25 }
 0x23a   : > { %p5735_p0 = pnand %p5738_p13, %p6192_p6 }
 0x23c   : > { %p5736_p1 = pneg %p5735_p0 }
 0x23e   : > { %6108 = dma.done.wait (%p5736_p1), %s4536_s26, 1024  }
 0x23f   : > { %6110 = vsyncadd (%p5736_p1), %s4536_s26, 4294966272  ;;  %p13_p2 = scmp.ge.s32.totalorder %s6175_s18, 4   ;;  %s8449_s12 = smov %s6117_s13 }
 0x240   : > { %s8450_s13 = smov %s6121_s14  ;;  %s8451_s14 = smov %s6186_s21 }
 0x241   : > { %s8452_s15 = smov %s6175_s18  ;;  %15 = sbr.rel (!%p13_p2) target bundleno = 3 (0x3), region = 67 }
 0x246   :  { %4541 = vsyncpa [#allocation3], 1 }
 0x247   :  { %4543 = vsyncpa [#allocation3 + $0x1], 1 }

</bundles_post_ra>
